<compile_context>
chip_gen: v7x
topology: tpu7x:2x2x1
jax: 0.10.0
libtpu: 0.0.40
codegen_flags: <defaults>
</compile_context>

<pallas_src>
import functools

import numpy as np
import jax
import jax.numpy as jnp
from jax import lax
from jax.experimental import pallas as pl
from jax.experimental.pallas import tpu as pltpu


# ----------------------------------------------------------------------------
# Steerable basis (numpy, deterministic) -- mirrors steerable_A +
# normalize_basis_by_min_scale from the reference implementation.
# ----------------------------------------------------------------------------
def _hermite_poly(X, n):
    coeff = [0.0] * n + [1.0]
    return np.polynomial.hermite_e.hermeval(X, coeff)


def _onescale_grid_hermite_gaussian(size, scale, max_order=None):
    max_order = max_order if max_order is not None else size - 1
    X = np.linspace(-(size // 2), size // 2, size)
    Y = np.linspace(-(size // 2), size // 2, size)
    order_y, order_x = np.indices([max_order + 1, max_order + 1])
    G = np.exp(-X ** 2 / (2 * scale ** 2)) / scale
    basis_x = np.stack([G * _hermite_poly(X / scale, n) for n in order_x.ravel()])
    basis_y = np.stack([G * _hermite_poly(Y / scale, n) for n in order_y.ravel()])
    return basis_x[:, :, None] * basis_y[:, None, :]   # [F, size, size]


def steerable_A(size, scales, effective_size):
    max_order = effective_size - 1
    max_scale = max(scales)
    basis_tensors = []
    for scale in scales:
        size_before_pad = int(size * scale / max_scale) // 2 * 2 + 1
        basis = _onescale_grid_hermite_gaussian(size_before_pad, scale, max_order)
        pad = (size - size_before_pad) // 2
        basis = np.pad(basis, ((0, 0), (pad, pad), (pad, pad)))
        basis_tensors.append(basis)
    return np.stack(basis_tensors, axis=1)   # [num_funcs, num_scales, size, size]


def normalize_basis_by_min_scale(basis):
    norm = np.sqrt((basis ** 2).sum(axis=(2, 3), keepdims=True))[:, [0]]
    return basis / norm


def _round_up(x, m):
    return ((x + m - 1) // m) * m


def _pick_b_tile(B, patch_img_bytes):
    # Pack several images per grid step (amortizes step overhead, widens GEMM
    # N) but keep >= 2 steps for pipelining and keep patch scratch small.
    for cand in (8, 4, 2):
        if B % cand == 0 and B // cand >= 2 and cand * patch_img_bytes <= (16 << 20):
            return cand
    return 1


# ----------------------------------------------------------------------------
# Fused im2col + single-GEMM Pallas kernel (B_TILE images per grid step).
#
#   kmat_ref  : [oS_pad, F_pad]          bf16  resident composed filter matrix
#   x_ref     : [B_TILE, C, P_in]        bf16  flattened zero-padded images
#   o_ref     : [B_TILE, oS_pad, P_out]  f32   stride-1 conv output (flattened)
#   patch_ref : [F_pad, B_TILE*P_out]    bf16  VMEM scratch (im2col matrix)
# ----------------------------------------------------------------------------
def _ses_conv_kernel(kmat_ref, x_ref, o_ref, patch_ref, *,
                     k, Wp, C, F, F_pad, P_out, B_TILE, reg_resident):
    # Keep the padded contraction rows zero (matching kmat columns are zero,
    # but uninitialized VMEM could hold NaN bit patterns).  Cheap: <16 rows.
    if F_pad > F:
        patch_ref[pl.ds(F, F_pad - F), :] = jnp.zeros(
            (F_pad - F, B_TILE * P_out), jnp.bfloat16)

    # Fused im2col.  Each image is loaded into a register-resident value once;
    # every tap (kh, kw) is a static lane-shifted slice of that value (XLU
    # rolls), written compactly (C rows per tap, no per-tap channel padding).
    for j in range(B_TILE):
        xv = x_ref[j] if reg_resident else None          # [C, P_in] bf16
        for kh in range(k):
            for kw in range(k):
                f = kh * k + kw                           # tap index (kh, kw)
                d = kh * Wp + kw                          # lane shift
                if reg_resident:
                    rows = xv[:, d:d + P_out]
                else:
                    rows = x_ref[j, :, pl.ds(d, P_out)]
                patch_ref[pl.ds(f * C, C), pl.ds(j * P_out, P_out)] = rows

    # One MXU GEMM per step: [oS_pad, F_pad] x [F_pad, B_TILE*P_out],
    # bf16 in / f32 accumulation.  Output stores are lane-dense (P_out % 128).
    res = jnp.dot(kmat_ref[...], patch_ref[...],
                  preferred_element_type=jnp.float32)
    for j in range(B_TILE):
        o_ref[j] = res[:, j * P_out:(j + 1) * P_out]


# ----------------------------------------------------------------------------
# SESConv_Z2_H forward: [B, C, H, W] -> [B, out_ch, S, H', W']
# ----------------------------------------------------------------------------
def ses_conv_z2_h_forward(x, weight, basis, *, stride=1, padding=0, bias=None):
    out_ch, in_ch, num_funcs = weight.shape
    F_basis, S, k, _ = basis.shape
    assert F_basis == num_funcs
    B, C, H, W = x.shape
    assert C == in_ch

    Hp, Wp = H + 2 * padding, W + 2 * padding
    Ho = (Hp - k) // stride + 1
    Wo = (Wp - k) // stride + 1

    oS = out_ch * S
    oS_pad = _round_up(oS, 16)              # bf16 sublane pack: 24 -> 32
    F = k * k * C                           # compact contraction (no per-tap pad)
    F_pad = _round_up(F, 16)                # pad ONCE at the end
    D_max = (k - 1) * Wp + (k - 1)          # largest lane shift of any tap
    P = Hp * Wp
    P_out = _round_up(P, 128)               # lane-dense output width
    P_in = _round_up(P_out + D_max, 128)    # lanes needed by shifted slices

    patch_img_bytes = F_pad * P_out * 2
    B_TILE = _pick_b_tile(B, patch_img_bytes)
    n_steps = B // B_TILE

    # Register-resident image only if it fits comfortably in the vreg file.
    xv_vregs = ((C + 15) // 16) * (P_in // 128)
    reg_resident = xv_vregs <= 32

    # ---- compose the filter matrix: weight @ basis (parameter glue, plain JAX)
    basis_flat = basis.reshape(num_funcs, -1)              # [Fb, S*k*k]
    kern = jnp.matmul(weight, basis_flat)                   # [o, c, S*k*k]
    kern = kern.reshape(out_ch, in_ch, S, k, k)             # [o, c, s, kh, kw]
    kern = jnp.transpose(kern, (0, 2, 3, 4, 1))             # [o, s, kh, kw, c]
    kmat = kern.reshape(oS, F)                               # rows=(o,s), cols=(kh,kw,c)
    kmat = jnp.pad(kmat, ((0, oS_pad - oS), (0, F_pad - F))).astype(jnp.bfloat16)

    # ---- flatten + zero-pad the input (small: no k^2 im2col blow-up in HBM)
    xp = jnp.pad(x, ((0, 0), (0, 0), (padding, padding), (padding, padding)))
    x_flat = xp.reshape(B, C, P)
    x_flat = jnp.pad(x_flat, ((0, 0), (0, 0), (0, P_in - P))).astype(jnp.bfloat16)
    # TODO(synk): for large inputs, fuse this pad/flatten (and the output
    # un-flatten below) into the kernel to avoid extra HBM round-trips.

    kernel = functools.partial(
        _ses_conv_kernel, k=k, Wp=Wp, C=C, F=F, F_pad=F_pad, P_out=P_out,
        B_TILE=B_TILE, reg_resident=reg_resident)

    # Explicit VMEM budget: resident kmat + patch scratch + double-buffered
    # x/out blocks (defaults: 16/32/32 MiB scoped on v5e/v6e/v7x).
    x_blk_bytes = B_TILE * C * P_in * 2
    out_blk_bytes = B_TILE * oS_pad * P_out * 4
    need = int(kmat.size) * 2 + B_TILE * patch_img_bytes \
        + 2 * x_blk_bytes + 2 * out_blk_bytes
    vmem_limit = int(min(max(2 * need, 32 << 20), 48 << 20))
    # TODO(synk): for v7x-sized problems (large C / spatial), add a grid axis
    # over P_out so the k^2-blown patch scratch stays within the scoped limit.

    flops = int(2 * B * oS_pad * F_pad * P_out)
    bytes_accessed = int(x_flat.size) * 2 + int(kmat.size) * 2 \
        + B * oS_pad * P_out * 4

    out = pl.pallas_call(
        kernel,
        out_shape=jax.ShapeDtypeStruct((B, oS_pad, P_out), jnp.float32),
        grid_spec=pltpu.PrefetchScalarGridSpec(
            num_scalar_prefetch=0,
            grid=(n_steps,),
            in_specs=[
                # composed filter matrix: same block every step -> stays in VMEM
                pl.BlockSpec((oS_pad, F_pad), lambda b: (0, 0)),
                # B_TILE flattened images per grid step
                pl.BlockSpec((B_TILE, C, P_in), lambda b: (b, 0, 0)),
            ],
            out_specs=pl.BlockSpec((B_TILE, oS_pad, P_out), lambda b: (b, 0, 0)),
            scratch_shapes=[pltpu.VMEM((F_pad, B_TILE * P_out), jnp.bfloat16)],
        ),
        compiler_params=pltpu.CompilerParams(
            dimension_semantics=("parallel",),
            vmem_limit_bytes=vmem_limit),
        cost_estimate=pl.CostEstimate(flops=flops, transcendentals=0,
                                      bytes_accessed=bytes_accessed),
    )(kmat, x_flat)

    # ---- un-flatten: drop row/col padding, keep only valid (non wrap-around)
    #      stride-1 positions, then subsample for stride.
    y_img = out[:, :oS, :P].reshape(B, out_ch, S, Hp, Wp)
    y = y_img[:, :, :,
              0:(Ho - 1) * stride + 1:stride,
              0:(Wo - 1) * stride + 1:stride]               # [B, out, S, Ho, Wo]
    # TODO(synk): if stride > 1 matters in practice, restrict the lane axis to
    # strided output positions instead of computing stride-1 and subsampling.
    if bias is not None:
        y = y + bias.reshape(1, -1, 1, 1, 1)
    return y


# ----------------------------------------------------------------------------
if __name__ == "__main__":
    # Module hyper-parameters (small, consistent with the PyTorch module)
    in_channels, out_channels = 4, 8
    kernel_size, effective_size = 7, 3
    scales = [round(s, 3) for s in [1.0, 1.26, 1.59]]
    stride, padding = 1, 3
    B, H, W = 2, 16, 16

    # Basis buffer (deterministic, matches steerable_A + normalization)
    basis_np = normalize_basis_by_min_scale(
        steerable_A(kernel_size, scales, effective_size)).astype(np.float32)
    basis = jnp.asarray(basis_np)                          # [F, S, k, k]
    num_funcs = basis.shape[0]
    S = basis.shape[1]

    # Deterministic weight init (kaiming_uniform(a=sqrt(5)) => U(-1/sqrt(fan_in), +))
    key = jax.random.PRNGKey(0)
    kw_key, kx_key = jax.random.split(key)
    fan_in = in_channels * num_funcs
    bound = 1.0 / np.sqrt(fan_in)
    weight = jax.random.uniform(kw_key, (out_channels, in_channels, num_funcs),
                                dtype=jnp.float32, minval=-bound, maxval=bound)
    bias = None   # bias=False is the module default

    x = jax.random.normal(kx_key, (B, in_channels, H, W), dtype=jnp.float32)

    y = ses_conv_z2_h_forward(x, weight, basis, stride=stride, padding=padding,
                              bias=bias)
    y = jax.block_until_ready(y)

    # Reference check: XLA conv on the SAME bf16-rounded operands, f32 accumulation.
    basis_flat = basis.reshape(num_funcs, -1)
    kern = jnp.matmul(weight, basis_flat).reshape(
        out_channels, in_channels, S, kernel_size, kernel_size)
    kern = jnp.transpose(kern, (0, 2, 1, 3, 4)).reshape(
        out_channels * S, in_channels, kernel_size, kernel_size)
    y_ref = lax.conv_general_dilated(
        x.astype(jnp.bfloat16), kern.astype(jnp.bfloat16),
        window_strides=(stride, stride),
        padding=[(padding, padding), (padding, padding)],
        dimension_numbers=("NCHW", "OIHW", "NCHW"),
        preferred_element_type=jnp.float32)
    Ho, Wo = y_ref.shape[2], y_ref.shape[3]
    y_ref = y_ref.reshape(B, out_channels, S, Ho, Wo)

    assert y.shape == (B, out_channels, S, Ho, Wo), y.shape
    np.testing.assert_allclose(np.asarray(y), np.asarray(y_ref),
                               rtol=1e-2, atol=1e-2)
    print("KERNEL_OK")
</pallas_src>

<mosaic_0001>
module attributes {stable_mosaic.version = 11 : i64} {
  func.func @_ses_conv_kernel(%arg0: i32, %arg1: memref<32x208xbf16, #tpu.memory_space<vmem>>, %arg2: memref<1x4x768xbf16, #tpu.memory_space<vmem>>, %arg3: memref<1x32x512xf32, #tpu.memory_space<vmem>>, %arg4: memref<208x512xbf16, #tpu.memory_space<vmem>>) attributes {dimension_semantics = [#tpu.dimension_semantics<parallel>], iteration_bounds = array<i64: 2>, scalar_prefetch = 0 : i64, scratch_operands = 1 : i64, tpu.core_type = #tpu.core_type<tc>, window_params = [{pipeline_mode = #tpu.pipeline_mode<synchronous>, transform_indices = @transform_0, window_bounds = array<i64: 32, 208>}, {transform_indices = @transform_1, window_bounds = array<i64: 1, 4, 768>}, {transform_indices = @transform_2, window_bounds = array<i64: 1, 32, 512>}]} {
    %cst = arith.constant 0.000000e+00 : bf16
    %0 = vector.broadcast %cst : bf16 to vector<12x512xbf16>
    %c196 = arith.constant 196 : index
    %c0 = arith.constant 0 : index
    %1 = vector.load %arg4[%c196, %c0] : memref<208x512xbf16, #tpu.memory_space<vmem>>, vector<12x512xbf16>
    tpu.vector_store %arg4[%c196, %c0], %0 {strides = array<i32>} : memref<208x512xbf16, #tpu.memory_space<vmem>>, vector<12x512xbf16>,
    %c0_0 = arith.constant 0 : index
    %c0_1 = arith.constant 0 : index
    %c0_2 = arith.constant 0 : index
    %2 = vector.load %arg2[%c0_0, %c0_1, %c0_2] : memref<1x4x768xbf16, #tpu.memory_space<vmem>>, vector<1x4x768xbf16>
    %3 = vector.shape_cast %2 : vector<1x4x768xbf16> to vector<4x768xbf16>
    %4 = vector.extract_strided_slice %3 {offsets = [0, 0], sizes = [4, 512], strides = [1, 1]} : vector<4x768xbf16> to vector<4x512xbf16>
    %c0_3 = arith.constant 0 : index
    %c0_4 = arith.constant 0 : index
    %5 = vector.load %arg4[%c0_3, %c0_4] : memref<208x512xbf16, #tpu.memory_space<vmem>>, vector<4x512xbf16>
    tpu.vector_store %arg4[%c0_3, %c0_4], %4 {strides = array<i32>} : memref<208x512xbf16, #tpu.memory_space<vmem>>, vector<4x512xbf16>,
    %6 = vector.extract_strided_slice %3 {offsets = [0, 1], sizes = [4, 512], strides = [1, 1]} : vector<4x768xbf16> to vector<4x512xbf16>
    %c4 = arith.constant 4 : index
    %c0_5 = arith.constant 0 : index
    %7 = vector.load %arg4[%c4, %c0_5] : memref<208x512xbf16, #tpu.memory_space<vmem>>, vector<4x512xbf16>
    tpu.vector_store %arg4[%c4, %c0_5], %6 {strides = array<i32>} : memref<208x512xbf16, #tpu.memory_space<vmem>>, vector<4x512xbf16>,
    %8 = vector.extract_strided_slice %3 {offsets = [0, 2], sizes = [4, 512], strides = [1, 1]} : vector<4x768xbf16> to vector<4x512xbf16>
    %c8 = arith.constant 8 : index
    %c0_6 = arith.constant 0 : index
    %9 = vector.load %arg4[%c8, %c0_6] : memref<208x512xbf16, #tpu.memory_space<vmem>>, vector<4x512xbf16>
    tpu.vector_store %arg4[%c8, %c0_6], %8 {strides = array<i32>} : memref<208x512xbf16, #tpu.memory_space<vmem>>, vector<4x512xbf16>,
    %10 = vector.extract_strided_slice %3 {offsets = [0, 3], sizes = [4, 512], strides = [1, 1]} : vector<4x768xbf16> to vector<4x512xbf16>
    %c12 = arith.constant 12 : index
    %c0_7 = arith.constant 0 : index
    %11 = vector.load %arg4[%c12, %c0_7] : memref<208x512xbf16, #tpu.memory_space<vmem>>, vector<4x512xbf16>
    tpu.vector_store %arg4[%c12, %c0_7], %10 {strides = array<i32>} : memref<208x512xbf16, #tpu.memory_space<vmem>>, vector<4x512xbf16>,
    %12 = vector.extract_strided_slice %3 {offsets = [0, 4], sizes = [4, 512], strides = [1, 1]} : vector<4x768xbf16> to vector<4x512xbf16>
    %c16 = arith.constant 16 : index
    %c0_8 = arith.constant 0 : index
    %13 = vector.load %arg4[%c16, %c0_8] : memref<208x512xbf16, #tpu.memory_space<vmem>>, vector<4x512xbf16>
    tpu.vector_store %arg4[%c16, %c0_8], %12 {strides = array<i32>} : memref<208x512xbf16, #tpu.memory_space<vmem>>, vector<4x512xbf16>,
    %14 = vector.extract_strided_slice %3 {offsets = [0, 5], sizes = [4, 512], strides = [1, 1]} : vector<4x768xbf16> to vector<4x512xbf16>
    %c20 = arith.constant 20 : index
    %c0_9 = arith.constant 0 : index
    %15 = vector.load %arg4[%c20, %c0_9] : memref<208x512xbf16, #tpu.memory_space<vmem>>, vector<4x512xbf16>
    tpu.vector_store %arg4[%c20, %c0_9], %14 {strides = array<i32>} : memref<208x512xbf16, #tpu.memory_space<vmem>>, vector<4x512xbf16>,
    %16 = vector.extract_strided_slice %3 {offsets = [0, 6], sizes = [4, 512], strides = [1, 1]} : vector<4x768xbf16> to vector<4x512xbf16>
    %c24 = arith.constant 24 : index
    %c0_10 = arith.constant 0 : index
    %17 = vector.load %arg4[%c24, %c0_10] : memref<208x512xbf16, #tpu.memory_space<vmem>>, vector<4x512xbf16>
    tpu.vector_store %arg4[%c24, %c0_10], %16 {strides = array<i32>} : memref<208x512xbf16, #tpu.memory_space<vmem>>, vector<4x512xbf16>,
    %18 = vector.extract_strided_slice %3 {offsets = [0, 22], sizes = [4, 512], strides = [1, 1]} : vector<4x768xbf16> to vector<4x512xbf16>
    %c28 = arith.constant 28 : index
    %c0_11 = arith.constant 0 : index
    %19 = vector.load %arg4[%c28, %c0_11] : memref<208x512xbf16, #tpu.memory_space<vmem>>, vector<4x512xbf16>
    tpu.vector_store %arg4[%c28, %c0_11], %18 {strides = array<i32>} : memref<208x512xbf16, #tpu.memory_space<vmem>>, vector<4x512xbf16>,
    %20 = vector.extract_strided_slice %3 {offsets = [0, 23], sizes = [4, 512], strides = [1, 1]} : vector<4x768xbf16> to vector<4x512xbf16>
    %c32 = arith.constant 32 : index
    %c0_12 = arith.constant 0 : index
    %21 = vector.load %arg4[%c32, %c0_12] : memref<208x512xbf16, #tpu.memory_space<vmem>>, vector<4x512xbf16>
    tpu.vector_store %arg4[%c32, %c0_12], %20 {strides = array<i32>} : memref<208x512xbf16, #tpu.memory_space<vmem>>, vector<4x512xbf16>,
    %22 = vector.extract_strided_slice %3 {offsets = [0, 24], sizes = [4, 512], strides = [1, 1]} : vector<4x768xbf16> to vector<4x512xbf16>
    %c36 = arith.constant 36 : index
    %c0_13 = arith.constant 0 : index
    %23 = vector.load %arg4[%c36, %c0_13] : memref<208x512xbf16, #tpu.memory_space<vmem>>, vector<4x512xbf16>
    tpu.vector_store %arg4[%c36, %c0_13], %22 {strides = array<i32>} : memref<208x512xbf16, #tpu.memory_space<vmem>>, vector<4x512xbf16>,
    %24 = vector.extract_strided_slice %3 {offsets = [0, 25], sizes = [4, 512], strides = [1, 1]} : vector<4x768xbf16> to vector<4x512xbf16>
    %c40 = arith.constant 40 : index
    %c0_14 = arith.constant 0 : index
    %25 = vector.load %arg4[%c40, %c0_14] : memref<208x512xbf16, #tpu.memory_space<vmem>>, vector<4x512xbf16>
    tpu.vector_store %arg4[%c40, %c0_14], %24 {strides = array<i32>} : memref<208x512xbf16, #tpu.memory_space<vmem>>, vector<4x512xbf16>,
    %26 = vector.extract_strided_slice %3 {offsets = [0, 26], sizes = [4, 512], strides = [1, 1]} : vector<4x768xbf16> to vector<4x512xbf16>
    %c44 = arith.constant 44 : index
    %c0_15 = arith.constant 0 : index
    %27 = vector.load %arg4[%c44, %c0_15] : memref<208x512xbf16, #tpu.memory_space<vmem>>, vector<4x512xbf16>
    tpu.vector_store %arg4[%c44, %c0_15], %26 {strides = array<i32>} : memref<208x512xbf16, #tpu.memory_space<vmem>>, vector<4x512xbf16>,
    %28 = vector.extract_strided_slice %3 {offsets = [0, 27], sizes = [4, 512], strides = [1, 1]} : vector<4x768xbf16> to vector<4x512xbf16>
    %c48 = arith.constant 48 : index
    %c0_16 = arith.constant 0 : index
    %29 = vector.load %arg4[%c48, %c0_16] : memref<208x512xbf16, #tpu.memory_space<vmem>>, vector<4x512xbf16>
    tpu.vector_store %arg4[%c48, %c0_16], %28 {strides = array<i32>} : memref<208x512xbf16, #tpu.memory_space<vmem>>, vector<4x512xbf16>,
    %30 = vector.extract_strided_slice %3 {offsets = [0, 28], sizes = [4, 512], strides = [1, 1]} : vector<4x768xbf16> to vector<4x512xbf16>
    %c52 = arith.constant 52 : index
    %c0_17 = arith.constant 0 : index
    %31 = vector.load %arg4[%c52, %c0_17] : memref<208x512xbf16, #tpu.memory_space<vmem>>, vector<4x512xbf16>
    tpu.vector_store %arg4[%c52, %c0_17], %30 {strides = array<i32>} : memref<208x512xbf16, #tpu.memory_space<vmem>>, vector<4x512xbf16>,
    %32 = vector.extract_strided_slice %3 {offsets = [0, 44], sizes = [4, 512], strides = [1, 1]} : vector<4x768xbf16> to vector<4x512xbf16>
    %c56 = arith.constant 56 : index
    %c0_18 = arith.constant 0 : index
    %33 = vector.load %arg4[%c56, %c0_18] : memref<208x512xbf16, #tpu.memory_space<vmem>>, vector<4x512xbf16>
    tpu.vector_store %arg4[%c56, %c0_18], %32 {strides = array<i32>} : memref<208x512xbf16, #tpu.memory_space<vmem>>, vector<4x512xbf16>,
    %34 = vector.extract_strided_slice %3 {offsets = [0, 45], sizes = [4, 512], strides = [1, 1]} : vector<4x768xbf16> to vector<4x512xbf16>
    %c60 = arith.constant 60 : index
    %c0_19 = arith.constant 0 : index
    %35 = vector.load %arg4[%c60, %c0_19] : memref<208x512xbf16, #tpu.memory_space<vmem>>, vector<4x512xbf16>
    tpu.vector_store %arg4[%c60, %c0_19], %34 {strides = array<i32>} : memref<208x512xbf16, #tpu.memory_space<vmem>>, vector<4x512xbf16>,
    %36 = vector.extract_strided_slice %3 {offsets = [0, 46], sizes = [4, 512], strides = [1, 1]} : vector<4x768xbf16> to vector<4x512xbf16>
    %c64 = arith.constant 64 : index
    %c0_20 = arith.constant 0 : index
    %37 = vector.load %arg4[%c64, %c0_20] : memref<208x512xbf16, #tpu.memory_space<vmem>>, vector<4x512xbf16>
    tpu.vector_store %arg4[%c64, %c0_20], %36 {strides = array<i32>} : memref<208x512xbf16, #tpu.memory_space<vmem>>, vector<4x512xbf16>,
    %38 = vector.extract_strided_slice %3 {offsets = [0, 47], sizes = [4, 512], strides = [1, 1]} : vector<4x768xbf16> to vector<4x512xbf16>
    %c68 = arith.constant 68 : index
    %c0_21 = arith.constant 0 : index
    %39 = vector.load %arg4[%c68, %c0_21] : memref<208x512xbf16, #tpu.memory_space<vmem>>, vector<4x512xbf16>
    tpu.vector_store %arg4[%c68, %c0_21], %38 {strides = array<i32>} : memref<208x512xbf16, #tpu.memory_space<vmem>>, vector<4x512xbf16>,
    %40 = vector.extract_strided_slice %3 {offsets = [0, 48], sizes = [4, 512], strides = [1, 1]} : vector<4x768xbf16> to vector<4x512xbf16>
    %c72 = arith.constant 72 : index
    %c0_22 = arith.constant 0 : index
    %41 = vector.load %arg4[%c72, %c0_22] : memref<208x512xbf16, #tpu.memory_space<vmem>>, vector<4x512xbf16>
    tpu.vector_store %arg4[%c72, %c0_22], %40 {strides = array<i32>} : memref<208x512xbf16, #tpu.memory_space<vmem>>, vector<4x512xbf16>,
    %42 = vector.extract_strided_slice %3 {offsets = [0, 49], sizes = [4, 512], strides = [1, 1]} : vector<4x768xbf16> to vector<4x512xbf16>
    %c76 = arith.constant 76 : index
    %c0_23 = arith.constant 0 : index
    %43 = vector.load %arg4[%c76, %c0_23] : memref<208x512xbf16, #tpu.memory_space<vmem>>, vector<4x512xbf16>
    tpu.vector_store %arg4[%c76, %c0_23], %42 {strides = array<i32>} : memref<208x512xbf16, #tpu.memory_space<vmem>>, vector<4x512xbf16>,
    %44 = vector.extract_strided_slice %3 {offsets = [0, 50], sizes = [4, 512], strides = [1, 1]} : vector<4x768xbf16> to vector<4x512xbf16>
    %c80 = arith.constant 80 : index
    %c0_24 = arith.constant 0 : index
    %45 = vector.load %arg4[%c80, %c0_24] : memref<208x512xbf16, #tpu.memory_space<vmem>>, vector<4x512xbf16>
    tpu.vector_store %arg4[%c80, %c0_24], %44 {strides = array<i32>} : memref<208x512xbf16, #tpu.memory_space<vmem>>, vector<4x512xbf16>,
    %46 = vector.extract_strided_slice %3 {offsets = [0, 66], sizes = [4, 512], strides = [1, 1]} : vector<4x768xbf16> to vector<4x512xbf16>
    %c84 = arith.constant 84 : index
    %c0_25 = arith.constant 0 : index
    %47 = vector.load %arg4[%c84, %c0_25] : memref<208x512xbf16, #tpu.memory_space<vmem>>, vector<4x512xbf16>
    tpu.vector_store %arg4[%c84, %c0_25], %46 {strides = array<i32>} : memref<208x512xbf16, #tpu.memory_space<vmem>>, vector<4x512xbf16>,
    %48 = vector.extract_strided_slice %3 {offsets = [0, 67], sizes = [4, 512], strides = [1, 1]} : vector<4x768xbf16> to vector<4x512xbf16>
    %c88 = arith.constant 88 : index
    %c0_26 = arith.constant 0 : index
    %49 = vector.load %arg4[%c88, %c0_26] : memref<208x512xbf16, #tpu.memory_space<vmem>>, vector<4x512xbf16>
    tpu.vector_store %arg4[%c88, %c0_26], %48 {strides = array<i32>} : memref<208x512xbf16, #tpu.memory_space<vmem>>, vector<4x512xbf16>,
    %50 = vector.extract_strided_slice %3 {offsets = [0, 68], sizes = [4, 512], strides = [1, 1]} : vector<4x768xbf16> to vector<4x512xbf16>
    %c92 = arith.constant 92 : index
    %c0_27 = arith.constant 0 : index
    %51 = vector.load %arg4[%c92, %c0_27] : memref<208x512xbf16, #tpu.memory_space<vmem>>, vector<4x512xbf16>
    tpu.vector_store %arg4[%c92, %c0_27], %50 {strides = array<i32>} : memref<208x512xbf16, #tpu.memory_space<vmem>>, vector<4x512xbf16>,
    %52 = vector.extract_strided_slice %3 {offsets = [0, 69], sizes = [4, 512], strides = [1, 1]} : vector<4x768xbf16> to vector<4x512xbf16>
    %c96 = arith.constant 96 : index
    %c0_28 = arith.constant 0 : index
    %53 = vector.load %arg4[%c96, %c0_28] : memref<208x512xbf16, #tpu.memory_space<vmem>>, vector<4x512xbf16>
    tpu.vector_store %arg4[%c96, %c0_28], %52 {strides = array<i32>} : memref<208x512xbf16, #tpu.memory_space<vmem>>, vector<4x512xbf16>,
    %54 = vector.extract_strided_slice %3 {offsets = [0, 70], sizes = [4, 512], strides = [1, 1]} : vector<4x768xbf16> to vector<4x512xbf16>
    %c100 = arith.constant 100 : index
    %c0_29 = arith.constant 0 : index
    %55 = vector.load %arg4[%c100, %c0_29] : memref<208x512xbf16, #tpu.memory_space<vmem>>, vector<4x512xbf16>
    tpu.vector_store %arg4[%c100, %c0_29], %54 {strides = array<i32>} : memref<208x512xbf16, #tpu.memory_space<vmem>>, vector<4x512xbf16>,
    %56 = vector.extract_strided_slice %3 {offsets = [0, 71], sizes = [4, 512], strides = [1, 1]} : vector<4x768xbf16> to vector<4x512xbf16>
    %c104 = arith.constant 104 : index
    %c0_30 = arith.constant 0 : index
    %57 = vector.load %arg4[%c104, %c0_30] : memref<208x512xbf16, #tpu.memory_space<vmem>>, vector<4x512xbf16>
    tpu.vector_store %arg4[%c104, %c0_30], %56 {strides = array<i32>} : memref<208x512xbf16, #tpu.memory_space<vmem>>, vector<4x512xbf16>,
    %58 = vector.extract_strided_slice %3 {offsets = [0, 72], sizes = [4, 512], strides = [1, 1]} : vector<4x768xbf16> to vector<4x512xbf16>
    %c108 = arith.constant 108 : index
    %c0_31 = arith.constant 0 : index
    %59 = vector.load %arg4[%c108, %c0_31] : memref<208x512xbf16, #tpu.memory_space<vmem>>, vector<4x512xbf16>
    tpu.vector_store %arg4[%c108, %c0_31], %58 {strides = array<i32>} : memref<208x512xbf16, #tpu.memory_space<vmem>>, vector<4x512xbf16>,
    %60 = vector.extract_strided_slice %3 {offsets = [0, 88], sizes = [4, 512], strides = [1, 1]} : vector<4x768xbf16> to vector<4x512xbf16>
    %c112 = arith.constant 112 : index
    %c0_32 = arith.constant 0 : index
    %61 = vector.load %arg4[%c112, %c0_32] : memref<208x512xbf16, #tpu.memory_space<vmem>>, vector<4x512xbf16>
    tpu.vector_store %arg4[%c112, %c0_32], %60 {strides = array<i32>} : memref<208x512xbf16, #tpu.memory_space<vmem>>, vector<4x512xbf16>,
    %62 = vector.extract_strided_slice %3 {offsets = [0, 89], sizes = [4, 512], strides = [1, 1]} : vector<4x768xbf16> to vector<4x512xbf16>
    %c116 = arith.constant 116 : index
    %c0_33 = arith.constant 0 : index
    %63 = vector.load %arg4[%c116, %c0_33] : memref<208x512xbf16, #tpu.memory_space<vmem>>, vector<4x512xbf16>
    tpu.vector_store %arg4[%c116, %c0_33], %62 {strides = array<i32>} : memref<208x512xbf16, #tpu.memory_space<vmem>>, vector<4x512xbf16>,
    %64 = vector.extract_strided_slice %3 {offsets = [0, 90], sizes = [4, 512], strides = [1, 1]} : vector<4x768xbf16> to vector<4x512xbf16>
    %c120 = arith.constant 120 : index
    %c0_34 = arith.constant 0 : index
    %65 = vector.load %arg4[%c120, %c0_34] : memref<208x512xbf16, #tpu.memory_space<vmem>>, vector<4x512xbf16>
    tpu.vector_store %arg4[%c120, %c0_34], %64 {strides = array<i32>} : memref<208x512xbf16, #tpu.memory_space<vmem>>, vector<4x512xbf16>,
    %66 = vector.extract_strided_slice %3 {offsets = [0, 91], sizes = [4, 512], strides = [1, 1]} : vector<4x768xbf16> to vector<4x512xbf16>
    %c124 = arith.constant 124 : index
    %c0_35 = arith.constant 0 : index
    %67 = vector.load %arg4[%c124, %c0_35] : memref<208x512xbf16, #tpu.memory_space<vmem>>, vector<4x512xbf16>
    tpu.vector_store %arg4[%c124, %c0_35], %66 {strides = array<i32>} : memref<208x512xbf16, #tpu.memory_space<vmem>>, vector<4x512xbf16>,
    %68 = vector.extract_strided_slice %3 {offsets = [0, 92], sizes = [4, 512], strides = [1, 1]} : vector<4x768xbf16> to vector<4x512xbf16>
    %c128 = arith.constant 128 : index
    %c0_36 = arith.constant 0 : index
    %69 = vector.load %arg4[%c128, %c0_36] : memref<208x512xbf16, #tpu.memory_space<vmem>>, vector<4x512xbf16>
    tpu.vector_store %arg4[%c128, %c0_36], %68 {strides = array<i32>} : memref<208x512xbf16, #tpu.memory_space<vmem>>, vector<4x512xbf16>,
    %70 = vector.extract_strided_slice %3 {offsets = [0, 93], sizes = [4, 512], strides = [1, 1]} : vector<4x768xbf16> to vector<4x512xbf16>
    %c132 = arith.constant 132 : index
    %c0_37 = arith.constant 0 : index
    %71 = vector.load %arg4[%c132, %c0_37] : memref<208x512xbf16, #tpu.memory_space<vmem>>, vector<4x512xbf16>
    tpu.vector_store %arg4[%c132, %c0_37], %70 {strides = array<i32>} : memref<208x512xbf16, #tpu.memory_space<vmem>>, vector<4x512xbf16>,
    %72 = vector.extract_strided_slice %3 {offsets = [0, 94], sizes = [4, 512], strides = [1, 1]} : vector<4x768xbf16> to vector<4x512xbf16>
    %c136 = arith.constant 136 : index
    %c0_38 = arith.constant 0 : index
    %73 = vector.load %arg4[%c136, %c0_38] : memref<208x512xbf16, #tpu.memory_space<vmem>>, vector<4x512xbf16>
    tpu.vector_store %arg4[%c136, %c0_38], %72 {strides = array<i32>} : memref<208x512xbf16, #tpu.memory_space<vmem>>, vector<4x512xbf16>,
    %74 = vector.extract_strided_slice %3 {offsets = [0, 110], sizes = [4, 512], strides = [1, 1]} : vector<4x768xbf16> to vector<4x512xbf16>
    %c140 = arith.constant 140 : index
    %c0_39 = arith.constant 0 : index
    %75 = vector.load %arg4[%c140, %c0_39] : memref<208x512xbf16, #tpu.memory_space<vmem>>, vector<4x512xbf16>
    tpu.vector_store %arg4[%c140, %c0_39], %74 {strides = array<i32>} : memref<208x512xbf16, #tpu.memory_space<vmem>>, vector<4x512xbf16>,
    %76 = vector.extract_strided_slice %3 {offsets = [0, 111], sizes = [4, 512], strides = [1, 1]} : vector<4x768xbf16> to vector<4x512xbf16>
    %c144 = arith.constant 144 : index
    %c0_40 = arith.constant 0 : index
    %77 = vector.load %arg4[%c144, %c0_40] : memref<208x512xbf16, #tpu.memory_space<vmem>>, vector<4x512xbf16>
    tpu.vector_store %arg4[%c144, %c0_40], %76 {strides = array<i32>} : memref<208x512xbf16, #tpu.memory_space<vmem>>, vector<4x512xbf16>,
    %78 = vector.extract_strided_slice %3 {offsets = [0, 112], sizes = [4, 512], strides = [1, 1]} : vector<4x768xbf16> to vector<4x512xbf16>
    %c148 = arith.constant 148 : index
    %c0_41 = arith.constant 0 : index
    %79 = vector.load %arg4[%c148, %c0_41] : memref<208x512xbf16, #tpu.memory_space<vmem>>, vector<4x512xbf16>
    tpu.vector_store %arg4[%c148, %c0_41], %78 {strides = array<i32>} : memref<208x512xbf16, #tpu.memory_space<vmem>>, vector<4x512xbf16>,
    %80 = vector.extract_strided_slice %3 {offsets = [0, 113], sizes = [4, 512], strides = [1, 1]} : vector<4x768xbf16> to vector<4x512xbf16>
    %c152 = arith.constant 152 : index
    %c0_42 = arith.constant 0 : index
    %81 = vector.load %arg4[%c152, %c0_42] : memref<208x512xbf16, #tpu.memory_space<vmem>>, vector<4x512xbf16>
    tpu.vector_store %arg4[%c152, %c0_42], %80 {strides = array<i32>} : memref<208x512xbf16, #tpu.memory_space<vmem>>, vector<4x512xbf16>,
    %82 = vector.extract_strided_slice %3 {offsets = [0, 114], sizes = [4, 512], strides = [1, 1]} : vector<4x768xbf16> to vector<4x512xbf16>
    %c156 = arith.constant 156 : index
    %c0_43 = arith.constant 0 : index
    %83 = vector.load %arg4[%c156, %c0_43] : memref<208x512xbf16, #tpu.memory_space<vmem>>, vector<4x512xbf16>
    tpu.vector_store %arg4[%c156, %c0_43], %82 {strides = array<i32>} : memref<208x512xbf16, #tpu.memory_space<vmem>>, vector<4x512xbf16>,
    %84 = vector.extract_strided_slice %3 {offsets = [0, 115], sizes = [4, 512], strides = [1, 1]} : vector<4x768xbf16> to vector<4x512xbf16>
    %c160 = arith.constant 160 : index
    %c0_44 = arith.constant 0 : index
    %85 = vector.load %arg4[%c160, %c0_44] : memref<208x512xbf16, #tpu.memory_space<vmem>>, vector<4x512xbf16>
    tpu.vector_store %arg4[%c160, %c0_44], %84 {strides = array<i32>} : memref<208x512xbf16, #tpu.memory_space<vmem>>, vector<4x512xbf16>,
    %86 = vector.extract_strided_slice %3 {offsets = [0, 116], sizes = [4, 512], strides = [1, 1]} : vector<4x768xbf16> to vector<4x512xbf16>
    %c164 = arith.constant 164 : index
    %c0_45 = arith.constant 0 : index
    %87 = vector.load %arg4[%c164, %c0_45] : memref<208x512xbf16, #tpu.memory_space<vmem>>, vector<4x512xbf16>
    tpu.vector_store %arg4[%c164, %c0_45], %86 {strides = array<i32>} : memref<208x512xbf16, #tpu.memory_space<vmem>>, vector<4x512xbf16>,
    %88 = vector.extract_strided_slice %3 {offsets = [0, 132], sizes = [4, 512], strides = [1, 1]} : vector<4x768xbf16> to vector<4x512xbf16>
    %c168 = arith.constant 168 : index
    %c0_46 = arith.constant 0 : index
    %89 = vector.load %arg4[%c168, %c0_46] : memref<208x512xbf16, #tpu.memory_space<vmem>>, vector<4x512xbf16>
    tpu.vector_store %arg4[%c168, %c0_46], %88 {strides = array<i32>} : memref<208x512xbf16, #tpu.memory_space<vmem>>, vector<4x512xbf16>,
    %90 = vector.extract_strided_slice %3 {offsets = [0, 133], sizes = [4, 512], strides = [1, 1]} : vector<4x768xbf16> to vector<4x512xbf16>
    %c172 = arith.constant 172 : index
    %c0_47 = arith.constant 0 : index
    %91 = vector.load %arg4[%c172, %c0_47] : memref<208x512xbf16, #tpu.memory_space<vmem>>, vector<4x512xbf16>
    tpu.vector_store %arg4[%c172, %c0_47], %90 {strides = array<i32>} : memref<208x512xbf16, #tpu.memory_space<vmem>>, vector<4x512xbf16>,
    %92 = vector.extract_strided_slice %3 {offsets = [0, 134], sizes = [4, 512], strides = [1, 1]} : vector<4x768xbf16> to vector<4x512xbf16>
    %c176 = arith.constant 176 : index
    %c0_48 = arith.constant 0 : index
    %93 = vector.load %arg4[%c176, %c0_48] : memref<208x512xbf16, #tpu.memory_space<vmem>>, vector<4x512xbf16>
    tpu.vector_store %arg4[%c176, %c0_48], %92 {strides = array<i32>} : memref<208x512xbf16, #tpu.memory_space<vmem>>, vector<4x512xbf16>,
    %94 = vector.extract_strided_slice %3 {offsets = [0, 135], sizes = [4, 512], strides = [1, 1]} : vector<4x768xbf16> to vector<4x512xbf16>
    %c180 = arith.constant 180 : index
    %c0_49 = arith.constant 0 : index
    %95 = vector.load %arg4[%c180, %c0_49] : memref<208x512xbf16, #tpu.memory_space<vmem>>, vector<4x512xbf16>
    tpu.vector_store %arg4[%c180, %c0_49], %94 {strides = array<i32>} : memref<208x512xbf16, #tpu.memory_space<vmem>>, vector<4x512xbf16>,
    %96 = vector.extract_strided_slice %3 {offsets = [0, 136], sizes = [4, 512], strides = [1, 1]} : vector<4x768xbf16> to vector<4x512xbf16>
    %c184 = arith.constant 184 : index
    %c0_50 = arith.constant 0 : index
    %97 = vector.load %arg4[%c184, %c0_50] : memref<208x512xbf16, #tpu.memory_space<vmem>>, vector<4x512xbf16>
    tpu.vector_store %arg4[%c184, %c0_50], %96 {strides = array<i32>} : memref<208x512xbf16, #tpu.memory_space<vmem>>, vector<4x512xbf16>,
    %98 = vector.extract_strided_slice %3 {offsets = [0, 137], sizes = [4, 512], strides = [1, 1]} : vector<4x768xbf16> to vector<4x512xbf16>
    %c188 = arith.constant 188 : index
    %c0_51 = arith.constant 0 : index
    %99 = vector.load %arg4[%c188, %c0_51] : memref<208x512xbf16, #tpu.memory_space<vmem>>, vector<4x512xbf16>
    tpu.vector_store %arg4[%c188, %c0_51], %98 {strides = array<i32>} : memref<208x512xbf16, #tpu.memory_space<vmem>>, vector<4x512xbf16>,
    %100 = vector.extract_strided_slice %3 {offsets = [0, 138], sizes = [4, 512], strides = [1, 1]} : vector<4x768xbf16> to vector<4x512xbf16>
    %c192 = arith.constant 192 : index
    %c0_52 = arith.constant 0 : index
    %101 = vector.load %arg4[%c192, %c0_52] : memref<208x512xbf16, #tpu.memory_space<vmem>>, vector<4x512xbf16>
    tpu.vector_store %arg4[%c192, %c0_52], %100 {strides = array<i32>} : memref<208x512xbf16, #tpu.memory_space<vmem>>, vector<4x512xbf16>,
    %c0_53 = arith.constant 0 : index
    %c0_54 = arith.constant 0 : index
    %102 = vector.load %arg1[%c0_53, %c0_54] : memref<32x208xbf16, #tpu.memory_space<vmem>>, vector<32x208xbf16>
    %c0_55 = arith.constant 0 : index
    %c0_56 = arith.constant 0 : index
    %103 = vector.load %arg4[%c0_55, %c0_56] : memref<208x512xbf16, #tpu.memory_space<vmem>>, vector<208x512xbf16>
    %cst_57 = arith.constant dense<0.000000e+00> : vector<32x512xf32>
    %104 = tpu.matmul %102, %103, %cst_57 {dimension_numbers = #tpu.dot_dimension_numbers<[1], [0], [0], [1], [0, 0, 1, 1], [], []>} : vector<32x208xbf16>, vector<208x512xbf16>, vector<32x512xf32> -> vector<32x512xf32>
    %c0_58 = arith.constant 0 : index
    %c0_59 = arith.constant 0 : index
    %c0_60 = arith.constant 0 : index
    %105 = vector.load %arg3[%c0_58, %c0_59, %c0_60] : memref<1x32x512xf32, #tpu.memory_space<vmem>>, vector<1x32x512xf32>
    %106 = vector.shape_cast %105 : vector<1x32x512xf32> to vector<32x512xf32>
    %107 = vector.shape_cast %104 : vector<32x512xf32> to vector<1x32x512xf32>
    tpu.vector_store %arg3[%c0_58, %c0_59, %c0_60], %107 {strides = array<i32>} : memref<1x32x512xf32, #tpu.memory_space<vmem>>, vector<1x32x512xf32>,
    return
  }
  func.func @transform_0(%arg0: i32) -> (i32, i32) {
    %c0_i32 = arith.constant 0 : i32
    %c0_i32_0 = arith.constant 0 : i32
    %c0_i32_1 = arith.constant 0 : i32
    return %c0_i32, %c0_i32_0 : i32, i32
  }
  func.func @transform_1(%arg0: i32) -> (i32, i32, i32) {
    %c0_i32 = arith.constant 0 : i32
    %c0_i32_0 = arith.constant 0 : i32
    %c0_i32_1 = arith.constant 0 : i32
    return %arg0, %c0_i32, %c0_i32_0 : i32, i32, i32
  }
  func.func @transform_2(%arg0: i32) -> (i32, i32, i32) {
    %c0_i32 = arith.constant 0 : i32
    %c0_i32_0 = arith.constant 0 : i32
    %c0_i32_1 = arith.constant 0 : i32
    return %arg0, %c0_i32, %c0_i32_0 : i32, i32, i32
  }
}

</mosaic_0001>

<bundles_post_ra>
// kernel: tpu_custom_call.1
= control target key start
LH: loop header
LB: loop body
LE: loop exit
PB: predicated region body
PF: predicated region fallthrough
CT: control target
= control target key end

     0   :  { %7 = vsyncpa [#allocation4], 0  ;;  %s2887_s0 = inlined_call_operand.hbm [shape: bf16[32,208], index: 0, kind: input, shape index: {}]   ;;  %s2888_s1 = inlined_call_operand.hbm [shape: bf16[2,4,768], index: 1, kind: input, shape index: {}]   ;;  %s2889_s2 = inlined_call_operand.hbm [shape: f32[2,32,512], index: 2, kind: output, shape index: {}]  }
   0x1   :  { %8 = vsyncpa [#allocation7], 0 }
   0x2   :  { %10 = vsyncpa [#allocation7 + $0x1], 0 }
   0x3   :  { %11 = vsyncpa [#allocation5], 0 }
   0x4   :  { %13 = vsyncpa [#allocation5 + $0x1], 0  ;;  %s1970_s9 = smov 0   ;;  %s1972_s10 = smov 0  }
   0x5   :  { %s1974_s11 = smov 0   ;;  %s1976_s12 = smov 0  }
   0x6 LB: > { %s1991_s13 = sadd.s32 4294967295, %s1899_s12   ;;  %s1629_s14 = sadd.s32 4294967294, %s1899_s12   ;;  %s1899_s12 = sphi %s1976_s12, %s2909_s12   ;;  %s1895_s11 = sphi %s1974_s11, %s2908_s11   ;;  %s1891_s10 = sphi %s1972_s10, %s2907_s10   ;;  %s1887_s9 = sphi %s1970_s9, %s2906_s9  }
   0x7   : > { %p60_p0 = scmp.ne.s32.totalorder %s1891_s10, %s1887_s9  ;;  %p2890_p1 = scmp.eq.s32.totalorder %s1991_s13, 0 }
   0x8   : > { %p90_p3 = scmp.eq.s32.totalorder %s1629_s14, 1  ;;  %p1630_p5 = scmp.ge.s32.totalorder %s1899_s12, 1 }
   0x9   : > { %p2000_p4 = por %p2890_p1, %p60_p0  ;;  %p97_p7 = scmp.lt.s32.totalorder %s1899_s12, 3 }
   0xa   : > { %p2005_p6 = por %p90_p3, %p60_p0  ;;  %s1901_s18 = smov [#allocation3]  }
   0xb   : > { %s2893_s15 = scalar_select %p2000_p4, 1, 0 }
   0xc   : > { %s2894_s16 = scalar_select %p2005_p6, 1, 0 }
   0xd   : > { %p2010_p8 = pnand %p1630_p5, %p97_p7  ;;  %s109_s19 = sshll.u32 %s1901_s18, 4  ;;  %s2014_s19 = int_to_ptr.vmem [resolvable:$true] %s109_s19 }
   0xe   : > { %s2026_s21 = sadd.s32 1, %s1899_s12   ;;  %s47_s22 = sadd.s32 1, %s1895_s11 }
   0xf   : > { %s2895_s17 = scalar_select %p2010_p8, 1, 0 }
  0x10   : > { %p1664_p9 = pneg %p2010_p8  ;;  %s44_s23 = ssub.s32 %s1899_s12, %s2026_s21 }
  0x11   : > { %s1771_s26 = scalar_lea.hbm %s2887_s0, 512 }
  0x12   : > { %p2021_p11 = pnand %p1664_p9, %p2890_p1  ;;  %p1772_p12 = scmp.ne.s32.totalorder %s2887_s0, %s1771_s26 }
  0x13   : > { %p1778_p5 = scmp.lt.u32.totalorder %s1771_s26, %s2887_s0 }
  0x14   : > { %p1773_p13 = pneg %p2021_p11 }
  0x16   : > { %p1774_p0 = pnand %p1773_p13, %p1772_p12 }
  0x18   : > { %p1775_p3 = pneg %p1774_p0 }
  0x1a   : > { %p1780_p7 = pnand %p1778_p5, %p1775_p3 }
  0x1c   : > { %1783 = shalt.err (!%p1780_p7)
}
  0x1d   : > { %s1784_s3 = scalar_lea.vmem %s2014_s19, 512  ;;  %p1792_p2 = scmp.lt.s32.totalorder %s2014_s19, %s2014_s19 }
  0x1e   : > { %p1785_p9 = scmp.ne.s32.totalorder %s2014_s19, %s1784_s3  ;;  %p1793_p6 = scmp.lt.s32.totalorder %s1784_s3, %s1784_s3 }
  0x20   : > { %p1787_p10 = pnand %p1785_p9, %p1773_p13  ;;  %p1794_p4 = por %p1793_p6, %p1792_p2 }
  0x22   : > { %p1788_p1 = pneg %p1787_p10 }
  0x24   : > { %p1795_p8 = pnand %p1794_p4, %p1788_p1 }
  0x26   : > { %1798 = shalt.err (!%p1795_p8)
}
  0x27   : > { %s1902_s4 = smov 128   ;;  %s1903_s5 = smov 8  }
  0x28   : > { %1667 = dma.hbm_to_vmem [thread:$0]  (!%p2021_p11), %s2887_s0, 512, %s2014_s19, [#allocation4], %s1902_s4, %s1902_s4, %s1903_s5  }
  0x29   : > { %p45_p2 = scmp.eq.s32.totalorder %s44_s23, 0  ;;  %p54_p1 = scmp.ne.s32.totalorder %s1895_s11, %s1891_s10 }
  0x2a   : > { %p55_p4 = scmp.eq.s32.totalorder %s1899_s12, 0  ;;  %p1677_p6 = scmp.lt.s32.totalorder %s1899_s12, 2 }
  0x2b   : > { %s2057_s8 = scalar_select %p45_p2, %s1895_s11, %s47_s22  }
  0x2c   : > { %p56_p8 = por %p55_p4, %p54_p1  ;;  %p2897_p10 = scmp.eq.s32.totalorder %s1991_s13, 1 }
  0x2d   : > { %s123_s18 = sand.u32 1, %s1895_s11   ;;  %s1654_s24 = smul.u32 192, %s1899_s12 }
  0x2e   : > { %p2061_p12 = por %p2897_p10, %p54_p1  ;;  %s1653_s25 = smul.u32 12, %s123_s18 }
  0x2f   : > { %p2067_p13 = pnand %p1677_p6, %p56_p8  ;;  %s2074_s22 = scalar_lea.hbm %s2888_s1, %s1654_s24 }
  0x30   : > { %s127_s26 = scalar_lea.vmem [#allocation6], %s1653_s25  ;;  %s124_s28 = scalar_lea.sflag [#allocation7], %s123_s18 }
  0x31   : > { %s135_s27 = sshll.u32 %s127_s26, 4  ;;  %s1799_s29 = scalar_lea.hbm %s2074_s22, 192  ;;  %s2076_s27 = int_to_ptr.vmem [resolvable:$true] %s135_s27 }
  0x32   : > { %p1800_p11 = scmp.ne.s32.totalorder %s2074_s22, %s1799_s29  ;;  %p1801_p0 = pneg %p2067_p13 }
  0x33   : > { %s1804_s4 = scalar_lea.hbm %s2888_s1, 384  ;;  %p1805_p7 = scmp.lt.u32.totalorder %s2074_s22, %s2888_s1 }
  0x34   : > { %p1802_p3 = pnand %p1801_p0, %p1800_p11  ;;  %p1806_p9 = scmp.lt.u32.totalorder %s1804_s4, %s1799_s29 }
  0x35   : > { %p1808_p1 = scmp.lt.u32.totalorder %s1799_s29, %s2074_s22 }
  0x36   : > { %p1803_p5 = pneg %p1802_p3  ;;  %p1807_p2 = por %p1806_p9, %p1805_p7 }
  0x38   : > { %p1809_p4 = por %p1808_p1, %p1807_p2 }
  0x3a   : > { %p1810_p6 = pnand %p1809_p4, %p1803_p5 }
  0x3c   : > { %1813 = shalt.err (!%p1810_p6)
}
  0x3d   : > { %s1814_s7 = scalar_lea.vmem %s2076_s27, 192  ;;  %s1904_s18 = smov [#allocation6]  }
  0x3e   : > { %p1815_p8 = scmp.ne.s32.totalorder %s2076_s27, %s1814_s7  ;;  %s1819_s24 = sshll.u32 %s1904_s18, 4  ;;  %s1820_s24 = int_to_ptr.vmem [resolvable:$false] %s1819_s24 }
  0x3f   : > { %s1821_s25 = scalar_lea.vmem %s1820_s24, 384  ;;  %p1822_p3 = scmp.lt.s32.totalorder %s2076_s27, %s1820_s24 }
  0x40   : > { %p1817_p10 = pnand %p1815_p8, %p1801_p0  ;;  %p1823_p7 = scmp.lt.s32.totalorder %s1821_s25, %s1814_s7 }
  0x42   : > { %p1818_p11 = pneg %p1817_p10  ;;  %p1824_p9 = por %p1823_p7, %p1822_p3 }
  0x44   : > { %p1825_p2 = pnand %p1824_p9, %p1818_p11 }
  0x46   : > { %1828 = shalt.err (!%p1825_p2)
}
  0x47   : > { %1671 = dma.hbm_to_vmem [thread:$0]  (!%p2067_p13), %s2074_s22, 192, %s2076_s27, %s124_s28  }
  0x48   : > { %p2900_p5 = scmp.ne.s32.totalorder %s2895_s17, 0 }
  0x49   : > { %p2901_p0 = scmp.eq.s32.totalorder (!%p2900_p5), %s1991_s13, 0 }
  0x4a   : > { %144 = sbr.rel (%p2900_p5) target bundleno = 926 (0x39e), region = 28 }
  0x51   : > { %1874 = dma.done.wait (%p2901_p0), [#allocation4], 512   ;;  %p2902_p1 = pmov %p2901_p0 }
  0x52   : > { %s2110_s19 = sand.u32 1, %s1891_s10   ;;  %p2903_p4 = scmp.ne.s32.totalorder %s2893_s15, 0 }
  0x53   : > { %1876 = vsyncadd (%p2902_p1), [#allocation4], 4294966784  ;;  %s1655_s23 = smul.u32 12, %s2110_s19  ;;  %s151_s20 = scalar_lea.sflag [#allocation7], %s2110_s19 }
  0x55   : > { %s154_s26 = scalar_lea.vmem [#allocation6], %s1655_s23 }
  0x56   : > { %1878 = dma.done.wait (%p2903_p4), %s151_s20, 192  }
  0x57   : > { %1880 = vsyncadd (%p2903_p4), %s151_s20, 4294967104  ;;  %v187_v0 = vlaneseq  ;;  %v1905_v1 = vmov 1983009808   ;;  %v180_v6 = vld [vmem:[%s154_s26] sm:$0xff]  ;;  %v181_v7 = vld [vmem:[%s154_s26 + $0x8] sm:$0xf] }
  0x58   : > { %v185_v2 = vunpack.c.l.s4 %v1905_v1  ;;  %1637 = vst.sshfl [vmem:[#allocation2] sm:$0x3 pattern:$0x76325410] %v180_v6  ;;  %v209_v9 = vcombine.low %v180_v6, %v180_v6  ;;  %v183_v10 = vcombine.high %v180_v6, %v180_v6  ;;  %s1906_s17 = smov 126   ;;  %s1907_s22 = smov 127   ;;  %v218_v13 = vcombine.low %v181_v7, %v181_v7 }
  0x59   : > { %v188_v3 = vshrl.u32 %v187_v0, 7  ;;  %s1908_s15 = smov 125   ;;  %s1909_s27 = smov 124   ;;  %vm243_vm0 = vcmask 1039360   ;;  %vm269_vm1 = vcmask 1031168   ;;  %vm294_vm2 = vcmask 1022976  }
  0x5a   : > { %v186_v4 = vunpack.c.0.s8 %v185_v2  ;;  %1638 = vst.sshfl [vmem:[#allocation2 + $0x10] sm:$0x3 pattern:$0x76325410] %v183_v10  ;;  %s1910_s28 = smov 123   ;;  %s1911_s29 = smov 122  }
  0x5b   : > { %s1912_s30 = smov 106   ;;  %s1913_s3 = smov 105   ;;  %vm317_vm3 = vcmask 1014784   ;;  %vm340_vm4 = vcmask 1006592   ;;  %vm363_vm5 = vcmask 998400   ;;  %vm386_vm6 = vcmask 867328  }
  0x5c   : > { %v189_v5 = vsub.s32 %v186_v4, %v188_v3  ;;  %s1914_s4 = smov 104   ;;  %s1915_s5 = smov 103   ;;  %vm409_vm7 = vcmask 859136   ;;  %vm432_vm8 = vcmask 850944   ;;  %vm455_vm9 = vcmask 842752  }
  0x5d   : > { %s1916_s6 = smov 102   ;;  %s1917_s7 = smov 101   ;;  %vm478_vm10 = vcmask 834560   ;;  %vm501_vm11 = vcmask 826368   ;;  %vm524_vm12 = vcmask 818176   ;;  %vm547_vm13 = vcmask 687104  }
  0x5e   : > { %v2118_v8 = vrot.slane %v180_v6, %v189_v5  ;;  %v2122_v11 = vrot.slane %v209_v9, %v189_v5  ;;  %v2128_v14 = vrot.slane %v183_v10, %v189_v5  ;;  %v2137_v16 = vrot.slane %v218_v13, %v189_v5  ;;  %s1918_s18 = smov 100   ;;  %s1919_s24 = smov 84  }
  0x5f   : > { %v2144_v18 = vrot.slane %v181_v7, %v189_v5  ;;  %s1920_s25 = smov 83   ;;  %s1921_s23 = smov 82   ;;  %vm570_vm14 = vcmask 678912   ;;  %vm593_vm15 = vcmask 670720  }
  0x60   : > { %261 = vrot.lane.b32.xlu0 %v2118_v8, %s1906_s17  ;;  %237 = vrot.lane.b32.xlu1 %v2118_v8, %s1907_s22  ;;  %v2126_v12 = vcombine.high %v2118_v8, %v2118_v8  ;;  %v2133_v15 = vcombine.high %v2128_v14, %v2128_v14  ;;  %v2141_v17 = vcombine.low %v2118_v8, %v2118_v8  ;;  %s1922_s20 = smov 81   ;;  %s1923_s26 = smov 80  }
  0x61   : > { %v2150_v19 = vcombine.high %v2122_v11, %v2122_v11  ;;  %v2154_v20 = vcombine.low %v2128_v14, %v2128_v14  ;;  %v2160_v21 = vcombine.low %v2144_v18, %v2144_v18  ;;  %v2166_v22 = vcombine.low %v2122_v11, %v2122_v11 }
  0x62   : > { %205 = vst [vmem:[#allocation2 + $0x8] sm:$0x3] %v2126_v12  ;;  %207 = vst [vmem:[#allocation2 + $0x18] sm:$0x3] %v2133_v15  ;;  %v2174_v23 = vcombine.low %v2137_v16, %v2137_v16 }
  0x64   : > { %233 = vrot.lane.b32.xlu0 %v2122_v11, %s1907_s22  ;;  %239 = vrot.lane.b32.xlu1 %v2126_v12, %s1907_s22 }
  0x68   : > { %241 = vrot.lane.b32.xlu0 %v2137_v16, %s1907_s22  ;;  %259 = vrot.lane.b32.xlu1 %v2141_v17, %s1906_s17 }
  0x6c   : > { %235 = vrot.lane.b32.xlu0 %v2150_v19, %s1907_s22  ;;  %263 = vrot.lane.b32.xlu1 %v2154_v20, %s1906_s17  ;;  %s1925_s22 = smov 78  }
  0x70   : > { %265 = vrot.lane.b32.xlu0 %v2128_v14, %s1906_s17  ;;  %267 = vrot.lane.b32.xlu1 %v2160_v21, %s1906_s17  ;;  %s1924_s17 = smov 79  }
  0x74   : > { %284 = vrot.lane.b32.xlu0 %v2166_v22, %s1908_s15  ;;  %286 = vrot.lane.b32.xlu1 %v2122_v11, %s1908_s15 }
  0x78   : > { %288 = vrot.lane.b32.xlu0 %v2141_v17, %s1908_s15  ;;  %290 = vrot.lane.b32.xlu1 %v2118_v8, %s1908_s15 }
  0x7c   : > { %292 = vrot.lane.b32.xlu0 %v2174_v23, %s1908_s15  ;;  %307 = vrot.lane.b32.xlu1 %v2118_v8, %s1909_s27  ;;  %s1926_s15 = smov 62  }
  0x80   : > { %309 = vrot.lane.b32.xlu0 %v2126_v12, %s1909_s27  ;;  %311 = vrot.lane.b32.xlu1 %v2128_v14, %s1909_s27 }
  0x84   : > { %315 = vrot.lane.b32.xlu1 %v2144_v18, %s1909_s27  ;;  %313 = vrot.lane.b32.xlu0 %v2133_v15, %s1909_s27 }
  0x88   : > { %332 = vrot.lane.b32.xlu1 %v2150_v19, %s1910_s28  ;;  %330 = vrot.lane.b32.xlu0 %v2122_v11, %s1910_s28 }
  0x8c   : > { %336 = vrot.lane.b32.xlu1 %v2126_v12, %s1910_s28  ;;  %334 = vrot.lane.b32.xlu0 %v2118_v8, %s1910_s28 }
  0x90   : > { %353 = vrot.lane.b32.xlu1 %v2141_v17, %s1911_s29  ;;  %338 = vrot.lane.b32.xlu0 %v2137_v16, %s1910_s28 }
  0x94   : > { %357 = vrot.lane.b32.xlu1 %v2154_v20, %s1911_s29  ;;  %355 = vrot.lane.b32.xlu0 %v2118_v8, %s1911_s29 }
  0x98   : > { %361 = vrot.lane.b32.xlu1 %v2160_v21, %s1911_s29  ;;  %359 = vrot.lane.b32.xlu0 %v2128_v14, %s1911_s29 }
  0x9c   : > { %378 = vrot.lane.b32.xlu1 %v2122_v11, %s1912_s30  ;;  %376 = vrot.lane.b32.xlu0 %v2166_v22, %s1912_s30 }
  0xa0   : > { %382 = vrot.lane.b32.xlu1 %v2118_v8, %s1912_s30  ;;  %380 = vrot.lane.b32.xlu0 %v2141_v17, %s1912_s30 }
  0xa4   : > { %399 = vrot.lane.b32.xlu1 %v2118_v8, %s1913_s3  ;;  %384 = vrot.lane.b32.xlu0 %v2174_v23, %s1912_s30  ;;  %s1927_s30 = smov 61  }
  0xa8   : > { %403 = vrot.lane.b32.xlu1 %v2128_v14, %s1913_s3  ;;  %401 = vrot.lane.b32.xlu0 %v2126_v12, %s1913_s3 }
  0xac   : > { %407 = vrot.lane.b32.xlu1 %v2144_v18, %s1913_s3  ;;  %405 = vrot.lane.b32.xlu0 %v2133_v15, %s1913_s3  ;;  %s1928_s3 = smov 60  }
  0xb0   : > { %424 = vrot.lane.b32.xlu1 %v2150_v19, %s1914_s4  ;;  %422 = vrot.lane.b32.xlu0 %v2122_v11, %s1914_s4 }
  0xb4   : > { %428 = vrot.lane.b32.xlu1 %v2126_v12, %s1914_s4  ;;  %426 = vrot.lane.b32.xlu0 %v2118_v8, %s1914_s4 }
  0xb8   : > { %445 = vrot.lane.b32.xlu1 %v2141_v17, %s1915_s5  ;;  %430 = vrot.lane.b32.xlu0 %v2137_v16, %s1914_s4  ;;  %s1929_s4 = smov 59  }
  0xbc   : > { %449 = vrot.lane.b32.xlu1 %v2154_v20, %s1915_s5  ;;  %447 = vrot.lane.b32.xlu0 %v2118_v8, %s1915_s5 }
  0xc0   : > { %453 = vrot.lane.b32.xlu1 %v2160_v21, %s1915_s5  ;;  %451 = vrot.lane.b32.xlu0 %v2128_v14, %s1915_s5  ;;  %s1930_s5 = smov 58  }
  0xc4   : > { %470 = vrot.lane.b32.xlu1 %v2122_v11, %s1916_s6  ;;  %468 = vrot.lane.b32.xlu0 %v2166_v22, %s1916_s6 }
  0xc8   : > { %474 = vrot.lane.b32.xlu1 %v2118_v8, %s1916_s6  ;;  %472 = vrot.lane.b32.xlu0 %v2141_v17, %s1916_s6 }
  0xcc   : > { %491 = vrot.lane.b32.xlu1 %v2118_v8, %s1917_s7  ;;  %476 = vrot.lane.b32.xlu0 %v2174_v23, %s1916_s6  ;;  %s1931_s6 = smov 57  }
  0xd0   : > { %495 = vrot.lane.b32.xlu1 %v2128_v14, %s1917_s7  ;;  %493 = vrot.lane.b32.xlu0 %v2126_v12, %s1917_s7 }
  0xd2   : > { %v262_v24 = vpop.permute.xlu0 %261  ;;  %v238_v25 = vpop.permute.xlu1 %237 }
  0xd4   : > { %499 = vrot.lane.b32.xlu1 %v2144_v18, %s1917_s7  ;;  %497 = vrot.lane.b32.xlu0 %v2133_v15, %s1917_s7  ;;  %s1932_s7 = smov 56  }
  0xd6   : > { %v234_v26 = vpop.permute.xlu0 %233  ;;  %v240_v27 = vpop.permute.xlu1 %239 }
  0xd7   : > { %v246_v28 = vsel %vm243_vm0, %v238_v25, %v240_v27 }
  0xd8   : > { %254 = vst [vmem:[#allocation2 + $0x10] sm:$0xc] %v246_v28  ;;  %516 = vrot.lane.b32.xlu1 %v2150_v19, %s1918_s18  ;;  %514 = vrot.lane.b32.xlu0 %v2122_v11, %s1918_s18 }
  0xda   : > { %v242_v29 = vpop.permute.xlu0 %241  ;;  %v260_v30 = vpop.permute.xlu1 %259 }
  0xdb   : > { %v247_v31 = vsel %vm243_vm0, %v240_v27, %v242_v29  ;;  %v270_v32 = vsel %vm269_vm1, %v260_v30, %v262_v24 }
  0xdc   : > { %255 = vst [vmem:[#allocation2 + $0x18] sm:$0xc] %v247_v31  ;;  %278 = vst [vmem:[#allocation2] sm:$0x30] %v270_v32  ;;  %520 = vrot.lane.b32.xlu1 %v2126_v12, %s1918_s18  ;;  %518 = vrot.lane.b32.xlu0 %v2118_v8, %s1918_s18 }
  0xde   : > { %v236_v33 = vpop.permute.xlu0 %235  ;;  %v264_v34 = vpop.permute.xlu1 %263 }
  0xdf   : > { %v244_v35 = vsel %vm243_vm0, %v234_v26, %v236_v33  ;;  %v245_v36 = vsel %vm243_vm0, %v236_v33, %v238_v25  ;;  %v271_v37 = vsel %vm269_vm1, %v262_v24, %v264_v34  ;;  %vm616_vm0 = vcmask 662528  }
  0xe0   : > { %252 = vst [vmem:[#allocation2] sm:$0xc] %v244_v35  ;;  %253 = vst [vmem:[#allocation2 + $0x8] sm:$0xc] %v245_v36  ;;  %537 = vrot.lane.b32.xlu1 %v2141_v17, %s1919_s24  ;;  %522 = vrot.lane.b32.xlu0 %v2137_v16, %s1918_s18  ;;  %s1933_s18 = smov 40  }
  0xe1   : > { %279 = vst [vmem:[#allocation2 + $0x8] sm:$0x30] %v271_v37 }
  0xe2   : > { %v266_v38 = vpop.permute.xlu0 %265  ;;  %v268_v39 = vpop.permute.xlu1 %267 }
  0xe3   : > { %v272_v40 = vsel %vm269_vm1, %v264_v34, %v266_v38  ;;  %v273_v41 = vsel %vm269_vm1, %v266_v38, %v268_v39  ;;  %vm639_vm1 = vcmask 654336  }
  0xe4   : > { %280 = vst [vmem:[#allocation2 + $0x10] sm:$0x30] %v272_v40  ;;  %281 = vst [vmem:[#allocation2 + $0x18] sm:$0x30] %v273_v41  ;;  %541 = vrot.lane.b32.xlu1 %v2154_v20, %s1919_s24  ;;  %539 = vrot.lane.b32.xlu0 %v2118_v8, %s1919_s24 }
  0xe6   : > { %v285_v42 = vpop.permute.xlu0 %284  ;;  %v287_v43 = vpop.permute.xlu1 %286 }
  0xe7   : > { %v295_v44 = vsel %vm294_vm2, %v285_v42, %v287_v43 }
  0xe8   : > { %303 = vst [vmem:[#allocation2] sm:$0xc0] %v295_v44  ;;  %545 = vrot.lane.b32.xlu1 %v2160_v21, %s1919_s24  ;;  %543 = vrot.lane.b32.xlu0 %v2128_v14, %s1919_s24  ;;  %s1934_s24 = smov 39  }
  0xea   : > { %v289_v45 = vpop.permute.xlu0 %288  ;;  %v291_v46 = vpop.permute.xlu1 %290 }
  0xeb   : > { %v296_v47 = vsel %vm294_vm2, %v287_v43, %v289_v45  ;;  %v297_v48 = vsel %vm294_vm2, %v289_v45, %v291_v46 }
  0xec   : > { %304 = vst [vmem:[#allocation2 + $0x8] sm:$0xc0] %v296_v47  ;;  %305 = vst [vmem:[#allocation2 + $0x10] sm:$0xc0] %v297_v48  ;;  %564 = vrot.lane.b32.xlu1 %v2141_v17, %s1920_s25  ;;  %562 = vrot.lane.b32.xlu0 %v2122_v11, %s1920_s25 }
  0xee   : > { %v293_v49 = vpop.permute.xlu0 %292  ;;  %v2260_v50 = vpop.permute.xlu1 %307 }
  0xef   : > { %v298_v51 = vsel %vm294_vm2, %v291_v46, %v293_v49  ;;  %v1331_v57 = vld [vmem:[#allocation2] sm:$0xff]  ;;  %vm662_vm2 = vcmask 646144  }
  0xf0   : > { %306 = vst [vmem:[#allocation2 + $0x18] sm:$0xc0] %v298_v51  ;;  %568 = vrot.lane.b32.xlu1 %v2174_v23, %s1920_s25  ;;  %566 = vrot.lane.b32.xlu0 %v2118_v8, %s1920_s25 }
  0xf2   : > { %v310_v52 = vpop.permute.xlu0 %309  ;;  %v2265_v53 = vpop.permute.xlu1 %311 }
  0xf3   : > { %v318_v54 = vsel %vm317_vm3, %v2260_v50, %v310_v52  ;;  %v319_v55 = vsel %vm317_vm3, %v310_v52, %v2265_v53  ;;  %v1332_v56 = vld [vmem:[#allocation2 + $0x8] sm:$0xff]  ;;  %v1333_v63 = vld [vmem:[#allocation2 + $0x10] sm:$0xff] }
  0xf4   : > { %326 = vst [vmem:[#allocation2 + $0x20] sm:$0x3] %v318_v54  ;;  %327 = vst [vmem:[#allocation2 + $0x28] sm:$0x3] %v319_v55  ;;  %585 = vrot.lane.b32.xlu1 %v2126_v12, %s1921_s23  ;;  %1408 = vmatprep.subr.bf16.mxu0 %v1332_v56 }
  0xf5   : > { %560 = vrot.lane.b32.xlu0 %v2166_v22, %s1920_s25  ;;  %1409 = vmatpush1.bf16.msra.mxu0 %v1331_v57  ;;  %s1935_s25 = smov 38  }
  0xf6   : > { %v2274_v58 = vpop.permute.xlu1 %315  ;;  %v314_v59 = vpop.permute.xlu0 %313 }
  0xf7   : > { %v320_v60 = vsel %vm317_vm3, %v2265_v53, %v314_v59  ;;  %v321_v61 = vsel %vm317_vm3, %v314_v59, %v2274_v58  ;;  %v1334_v62 = vld [vmem:[#allocation2 + $0x18] sm:$0xff] }
  0xf8   : > { %328 = vst [vmem:[#allocation2 + $0x30] sm:$0x3] %v320_v60  ;;  %329 = vst [vmem:[#allocation2 + $0x38] sm:$0x3] %v321_v61  ;;  %589 = vrot.lane.b32.xlu1 %v2133_v15, %s1921_s23  ;;  %1461 = vmatprep.subr.bf16.mxu1 %v1334_v62 }
  0xf9   : > { %587 = vrot.lane.b32.xlu0 %v2128_v14, %s1921_s23  ;;  %1462 = vmatpush1.bf16.msra.mxu1 %v1333_v63 }
  0xfa   : > { %v333_v0 = vpop.permute.xlu1 %332  ;;  %v2284_v1 = vpop.permute.xlu0 %330 }
  0xfb   : > { %v341_v2 = vsel %vm340_vm4, %v2284_v1, %v333_v0 }
  0xfc   : > { %349 = vst [vmem:[#allocation2 + $0x20] sm:$0xc] %v341_v2  ;;  %608 = vrot.lane.b32.xlu1 %v2150_v19, %s1922_s20 }
  0xfd   : > { %591 = vrot.lane.b32.xlu0 %v2144_v18, %s1921_s23 }
  0xfe   : > { %v337_v3 = vpop.permute.xlu1 %336  ;;  %v2292_v4 = vpop.permute.xlu0 %334 }
  0xff   : > { %v342_v5 = vsel %vm340_vm4, %v333_v0, %v2292_v4  ;;  %v343_v6 = vsel %vm340_vm4, %v2292_v4, %v337_v3 }
 0x100   : > { %350 = vst [vmem:[#allocation2 + $0x28] sm:$0xc] %v342_v5  ;;  %351 = vst [vmem:[#allocation2 + $0x30] sm:$0xc] %v343_v6  ;;  %612 = vrot.lane.b32.xlu1 %v2126_v12, %s1922_s20 }
 0x101   : > { %610 = vrot.lane.b32.xlu0 %v2118_v8, %s1922_s20 }
 0x102   : > { %v354_v7 = vpop.permute.xlu1 %353  ;;  %v2302_v9 = vpop.permute.xlu0 %338 }
 0x103   : > { %v344_v10 = vsel %vm340_vm4, %v337_v3, %v2302_v9 }
 0x104   : > { %352 = vst [vmem:[#allocation2 + $0x38] sm:$0xc] %v344_v10  ;;  %631 = vrot.lane.b32.xlu1 %v2118_v8, %s1923_s26 }
 0x105   : > { %614 = vrot.lane.b32.xlu0 %v2137_v16, %s1922_s20 }
 0x106   : > { %v358_v13 = vpop.permute.xlu1 %357  ;;  %v356_v24 = vpop.permute.xlu0 %355 }
 0x107   : > { %v364_v25 = vsel %vm363_vm5, %v354_v7, %v356_v24  ;;  %v365_v26 = vsel %vm363_vm5, %v356_v24, %v358_v13 }
 0x108   : > { %372 = vst [vmem:[#allocation2 + $0x20] sm:$0x30] %v364_v25  ;;  %373 = vst [vmem:[#allocation2 + $0x28] sm:$0x30] %v365_v26  ;;  %635 = vrot.lane.b32.xlu1 %v2128_v14, %s1923_s26 }
 0x109   : > { %633 = vrot.lane.b32.xlu0 %v2154_v20, %s1923_s26 }
 0x10a   : > { %v362_v27 = vpop.permute.xlu1 %361  ;;  %v2316_v28 = vpop.permute.xlu0 %359 }
 0x10b   : > { %v366_v29 = vsel %vm363_vm5, %v358_v13, %v2316_v28  ;;  %v367_v30 = vsel %vm363_vm5, %v2316_v28, %v362_v27 }
 0x10c   : > { %374 = vst [vmem:[#allocation2 + $0x30] sm:$0x30] %v366_v29  ;;  %375 = vst [vmem:[#allocation2 + $0x38] sm:$0x30] %v367_v30  ;;  %654 = vrot.lane.b32.xlu1 %v2122_v11, %s1924_s17 }
 0x10d   : > { %637 = vrot.lane.b32.xlu0 %v2160_v21, %s1923_s26 }
 0x10e   : > { %v379_v31 = vpop.permute.xlu1 %378  ;;  %v377_v32 = vpop.permute.xlu0 %376 }
 0x10f   : > { %v387_v33 = vsel %vm386_vm6, %v377_v32, %v379_v31 }
 0x110   : > { %395 = vst [vmem:[#allocation2 + $0x20] sm:$0xc0] %v387_v33  ;;  %658 = vrot.lane.b32.xlu1 %v2118_v8, %s1924_s17 }
 0x111   : > { %656 = vrot.lane.b32.xlu0 %v2141_v17, %s1924_s17 }
 0x112   : > { %v383_v34 = vpop.permute.xlu1 %382  ;;  %v381_v35 = vpop.permute.xlu0 %380 }
 0x113   : > { %v388_v36 = vsel %vm386_vm6, %v379_v31, %v381_v35  ;;  %v389_v37 = vsel %vm386_vm6, %v381_v35, %v383_v34 }
 0x114   : > { %396 = vst [vmem:[#allocation2 + $0x28] sm:$0xc0] %v388_v36  ;;  %397 = vst [vmem:[#allocation2 + $0x30] sm:$0xc0] %v389_v37  ;;  %583 = vrot.lane.b32.xlu1 %v2118_v8, %s1921_s23  ;;  %s1936_s23 = smov 37  }
 0x115   : > { %660 = vrot.lane.b32.xlu0 %v2174_v23, %s1924_s17 }
 0x116   : > { %v400_v38 = vpop.permute.xlu1 %399  ;;  %v385_v39 = vpop.permute.xlu0 %384 }
 0x117   : > { %v390_v40 = vsel %vm386_vm6, %v383_v34, %v385_v39  ;;  %v1335_v46 = vld [vmem:[#allocation2 + $0x20] sm:$0xff]  ;;  %vm685_vm6 = vcmask 637952  }
 0x118   : > { %398 = vst [vmem:[#allocation2 + $0x38] sm:$0xc0] %v390_v40  ;;  %629 = vrot.lane.b32.xlu1 %v2141_v17, %s1923_s26  ;;  %s1938_s26 = smov 35  }
 0x119   : > { %606 = vrot.lane.b32.xlu0 %v2122_v11, %s1922_s20  ;;  %s1937_s20 = smov 36  }
 0x11a   : > { %v404_v41 = vpop.permute.xlu1 %403  ;;  %v402_v42 = vpop.permute.xlu0 %401 }
 0x11b   : > { %v410_v43 = vsel %vm409_vm7, %v400_v38, %v402_v42  ;;  %v411_v44 = vsel %vm409_vm7, %v402_v42, %v404_v41  ;;  %v1336_v45 = vld [vmem:[#allocation2 + $0x28] sm:$0xff]  ;;  %v1337_v54 = vld [vmem:[#allocation2 + $0x30] sm:$0xff] }
 0x11c   : > { %418 = vst [vmem:[#allocation2 + $0x40] sm:$0x3] %v410_v43  ;;  %419 = vst [vmem:[#allocation2 + $0x48] sm:$0x3] %v411_v44  ;;  %677 = vrot.lane.b32.xlu1 %v2126_v12, %s1925_s22  ;;  %1410 = vmatprep.subr.bf16.mxu0 %v1336_v45 }
 0x11d   : > { %652 = vrot.lane.b32.xlu0 %v2166_v22, %s1924_s17  ;;  %1411 = vmatpush1.bf16.msra.mxu0 %v1335_v46  ;;  %s1939_s17 = smov 34  }
 0x11e   : > { %v408_v47 = vpop.permute.xlu1 %407  ;;  %v406_v48 = vpop.permute.xlu0 %405 }
 0x11f   : > { %v412_v49 = vsel %vm409_vm7, %v404_v41, %v406_v48  ;;  %v413_v51 = vsel %vm409_vm7, %v406_v48, %v408_v47  ;;  %v1338_v52 = vld [vmem:[#allocation2 + $0x38] sm:$0xff]  ;;  %vm708_vm7 = vcmask 506880  }
 0x120   : > { %420 = vst [vmem:[#allocation2 + $0x50] sm:$0x3] %v412_v49  ;;  %421 = vst [vmem:[#allocation2 + $0x58] sm:$0x3] %v413_v51  ;;  %681 = vrot.lane.b32.xlu1 %v2133_v15, %s1925_s22  ;;  %1463 = vmatprep.subr.bf16.mxu1 %v1338_v52 }
 0x121   : > { %679 = vrot.lane.b32.xlu0 %v2128_v14, %s1925_s22  ;;  %1464 = vmatpush1.bf16.msra.mxu1 %v1337_v54 }
 0x122   : > { %v425_v55 = vpop.permute.xlu1 %424  ;;  %v423_v56 = vpop.permute.xlu0 %422 }
 0x123   : > { %v433_v57 = vsel %vm432_vm8, %v423_v56, %v425_v55 }
 0x124   : > { %441 = vst [vmem:[#allocation2 + $0x40] sm:$0xc] %v433_v57  ;;  %700 = vrot.lane.b32.xlu1 %v2150_v19, %s1926_s15 }
 0x125   : > { %683 = vrot.lane.b32.xlu0 %v2144_v18, %s1925_s22 }
 0x126   : > { %v429_v59 = vpop.permute.xlu1 %428  ;;  %v427_v60 = vpop.permute.xlu0 %426 }
 0x127   : > { %v434_v61 = vsel %vm432_vm8, %v425_v55, %v427_v60  ;;  %v435_v62 = vsel %vm432_vm8, %v427_v60, %v429_v59 }
 0x128   : > { %442 = vst [vmem:[#allocation2 + $0x48] sm:$0xc] %v434_v61  ;;  %443 = vst [vmem:[#allocation2 + $0x50] sm:$0xc] %v435_v62  ;;  %704 = vrot.lane.b32.xlu1 %v2126_v12, %s1926_s15 }
 0x129   : > { %702 = vrot.lane.b32.xlu0 %v2118_v8, %s1926_s15 }
 0x12a   : > { %v446_v63 = vpop.permute.xlu1 %445  ;;  %v431_v0 = vpop.permute.xlu0 %430 }
 0x12b   : > { %v436_v2 = vsel %vm432_vm8, %v429_v59, %v431_v0  ;;  %vm731_vm8 = vcmask 498688  }
 0x12c   : > { %444 = vst [vmem:[#allocation2 + $0x58] sm:$0xc] %v436_v2  ;;  %723 = vrot.lane.b32.xlu1 %v2118_v8, %s1927_s30 }
 0x12d   : > { %706 = vrot.lane.b32.xlu0 %v2137_v16, %s1926_s15 }
 0x12e   : > { %v450_v3 = vpop.permute.xlu1 %449  ;;  %v448_v5 = vpop.permute.xlu0 %447 }
 0x12f   : > { %v456_v6 = vsel %vm455_vm9, %v446_v63, %v448_v5  ;;  %v457_v7 = vsel %vm455_vm9, %v448_v5, %v450_v3 }
 0x130   : > { %464 = vst [vmem:[#allocation2 + $0x40] sm:$0x30] %v456_v6  ;;  %465 = vst [vmem:[#allocation2 + $0x48] sm:$0x30] %v457_v7  ;;  %727 = vrot.lane.b32.xlu1 %v2128_v14, %s1927_s30 }
 0x131   : > { %725 = vrot.lane.b32.xlu0 %v2154_v20, %s1927_s30 }
 0x132   : > { %v454_v10 = vpop.permute.xlu1 %453  ;;  %v452_v13 = vpop.permute.xlu0 %451 }
 0x133   : > { %v458_v24 = vsel %vm455_vm9, %v450_v3, %v452_v13  ;;  %v459_v25 = vsel %vm455_vm9, %v452_v13, %v454_v10  ;;  %vm754_vm9 = vcmask 490496  }
 0x134   : > { %466 = vst [vmem:[#allocation2 + $0x50] sm:$0x30] %v458_v24  ;;  %467 = vst [vmem:[#allocation2 + $0x58] sm:$0x30] %v459_v25  ;;  %746 = vrot.lane.b32.xlu1 %v2122_v11, %s1928_s3 }
 0x135   : > { %729 = vrot.lane.b32.xlu0 %v2160_v21, %s1927_s30 }
 0x136   : > { %v471_v26 = vpop.permute.xlu1 %470  ;;  %v469_v27 = vpop.permute.xlu0 %468 }
 0x137   : > { %v479_v29 = vsel %vm478_vm10, %v469_v27, %v471_v26 }
 0x138   : > { %487 = vst [vmem:[#allocation2 + $0x40] sm:$0xc0] %v479_v29  ;;  %750 = vrot.lane.b32.xlu1 %v2118_v8, %s1928_s3 }
 0x139   : > { %748 = vrot.lane.b32.xlu0 %v2141_v17, %s1928_s3 }
 0x13a   : > { %v475_v30 = vpop.permute.xlu1 %474  ;;  %v473_v31 = vpop.permute.xlu0 %472 }
 0x13b   : > { %v480_v32 = vsel %vm478_vm10, %v471_v26, %v473_v31  ;;  %v481_v33 = vsel %vm478_vm10, %v473_v31, %v475_v30 }
 0x13c   : > { %488 = vst [vmem:[#allocation2 + $0x48] sm:$0xc0] %v480_v32  ;;  %489 = vst [vmem:[#allocation2 + $0x50] sm:$0xc0] %v481_v33  ;;  %675 = vrot.lane.b32.xlu1 %v2118_v8, %s1925_s22  ;;  %s1940_s22 = smov 18  }
 0x13d   : > { %752 = vrot.lane.b32.xlu0 %v2174_v23, %s1928_s3 }
 0x13e   : > { %v492_v34 = vpop.permute.xlu1 %491  ;;  %v477_v35 = vpop.permute.xlu0 %476 }
 0x13f   : > { %v482_v36 = vsel %vm478_vm10, %v475_v30, %v477_v35  ;;  %v1339_v42 = vld [vmem:[#allocation2 + $0x40] sm:$0xff]  ;;  %vm777_vm10 = vcmask 482304  }
 0x140   : > { %490 = vst [vmem:[#allocation2 + $0x58] sm:$0xc0] %v482_v36  ;;  %721 = vrot.lane.b32.xlu1 %v2141_v17, %s1927_s30  ;;  %s1942_s30 = smov 16  }
 0x141   : > { %698 = vrot.lane.b32.xlu0 %v2122_v11, %s1926_s15  ;;  %s1941_s15 = smov 17  }
 0x142   : > { %v496_v37 = vpop.permute.xlu1 %495  ;;  %v494_v38 = vpop.permute.xlu0 %493 }
 0x143   : > { %v502_v39 = vsel %vm501_vm11, %v492_v34, %v494_v38  ;;  %v503_v40 = vsel %vm501_vm11, %v494_v38, %v496_v37  ;;  %v1340_v41 = vld [vmem:[#allocation2 + $0x48] sm:$0xff]  ;;  %v1341_v48 = vld [vmem:[#allocation2 + $0x50] sm:$0xff] }
 0x144   : > { %510 = vst [vmem:[#allocation2 + $0x60] sm:$0x3] %v502_v39  ;;  %511 = vst [vmem:[#allocation2 + $0x68] sm:$0x3] %v503_v40  ;;  %769 = vrot.lane.b32.xlu1 %v2126_v12, %s1929_s4  ;;  %1412 = vmatprep.subr.bf16.mxu0 %v1340_v41 }
 0x145   : > { %744 = vrot.lane.b32.xlu0 %v2166_v22, %s1928_s3  ;;  %1413 = vmatpush1.bf16.msra.mxu0 %v1339_v42  ;;  %s1943_s3 = smov 15  }
 0x146   : > { %v500_v43 = vpop.permute.xlu1 %499  ;;  %v498_v44 = vpop.permute.xlu0 %497 }
 0x147   : > { %v504_v45 = vsel %vm501_vm11, %v496_v37, %v498_v44  ;;  %v505_v46 = vsel %vm501_vm11, %v498_v44, %v500_v43  ;;  %v1342_v47 = vld [vmem:[#allocation2 + $0x58] sm:$0xff]  ;;  %vm800_vm11 = vcmask 474112  }
 0x148   : > { %512 = vst [vmem:[#allocation2 + $0x70] sm:$0x3] %v504_v45  ;;  %513 = vst [vmem:[#allocation2 + $0x78] sm:$0x3] %v505_v46  ;;  %773 = vrot.lane.b32.xlu1 %v2133_v15, %s1929_s4  ;;  %1465 = vmatprep.subr.bf16.mxu1 %v1342_v47 }
 0x149   : > { %771 = vrot.lane.b32.xlu0 %v2128_v14, %s1929_s4  ;;  %1466 = vmatpush1.bf16.msra.mxu1 %v1341_v48 }
 0x14a   : > { %v517_v49 = vpop.permute.xlu1 %516  ;;  %v515_v51 = vpop.permute.xlu0 %514 }
 0x14b   : > { %v525_v52 = vsel %vm524_vm12, %v515_v51, %v517_v49 }
 0x14c   : > { %533 = vst [vmem:[#allocation2 + $0x60] sm:$0xc] %v525_v52  ;;  %792 = vrot.lane.b32.xlu1 %v2150_v19, %s1930_s5 }
 0x14d   : > { %775 = vrot.lane.b32.xlu0 %v2144_v18, %s1929_s4 }
 0x14e   : > { %v521_v54 = vpop.permute.xlu1 %520  ;;  %v519_v55 = vpop.permute.xlu0 %518 }
 0x14f   : > { %v526_v56 = vsel %vm524_vm12, %v517_v49, %v519_v55  ;;  %v527_v57 = vsel %vm524_vm12, %v519_v55, %v521_v54 }
 0x150   : > { %534 = vst [vmem:[#allocation2 + $0x68] sm:$0xc] %v526_v56  ;;  %535 = vst [vmem:[#allocation2 + $0x70] sm:$0xc] %v527_v57  ;;  %796 = vrot.lane.b32.xlu1 %v2126_v12, %s1930_s5 }
 0x151   : > { %794 = vrot.lane.b32.xlu0 %v2118_v8, %s1930_s5 }
 0x152   : > { %v538_v59 = vpop.permute.xlu1 %537  ;;  %v523_v60 = vpop.permute.xlu0 %522 }
 0x153   : > { %v528_v61 = vsel %vm524_vm12, %v521_v54, %v523_v60  ;;  %vm823_vm12 = vcmask 465920  }
 0x154   : > { %536 = vst [vmem:[#allocation2 + $0x78] sm:$0xc] %v528_v61  ;;  %815 = vrot.lane.b32.xlu1 %v2118_v8, %s1931_s6 }
 0x155   : > { %798 = vrot.lane.b32.xlu0 %v2137_v16, %s1930_s5 }
 0x156   : > { %v542_v62 = vpop.permute.xlu1 %541  ;;  %v540_v63 = vpop.permute.xlu0 %539 }
 0x157   : > { %v548_v0 = vsel %vm547_vm13, %v538_v59, %v540_v63  ;;  %v549_v2 = vsel %vm547_vm13, %v540_v63, %v542_v62 }
 0x158   : > { %556 = vst [vmem:[#allocation2 + $0x60] sm:$0x30] %v548_v0  ;;  %557 = vst [vmem:[#allocation2 + $0x68] sm:$0x30] %v549_v2  ;;  %819 = vrot.lane.b32.xlu1 %v2128_v14, %s1931_s6 }
 0x159   : > { %817 = vrot.lane.b32.xlu0 %v2154_v20, %s1931_s6 }
 0x15a   : > { %v546_v3 = vpop.permute.xlu1 %545  ;;  %v544_v5 = vpop.permute.xlu0 %543 }
 0x15b   : > { %v550_v6 = vsel %vm547_vm13, %v542_v62, %v544_v5  ;;  %v551_v7 = vsel %vm547_vm13, %v544_v5, %v546_v3  ;;  %vm846_vm13 = vcmask 457728  }
 0x15c   : > { %558 = vst [vmem:[#allocation2 + $0x70] sm:$0x30] %v550_v6  ;;  %559 = vst [vmem:[#allocation2 + $0x78] sm:$0x30] %v551_v7  ;;  %838 = vrot.lane.b32.xlu1 %v2122_v11, %s1932_s7 }
 0x15d   : > { %821 = vrot.lane.b32.xlu0 %v2160_v21, %s1931_s6 }
 0x15e   : > { %v565_v10 = vpop.permute.xlu1 %564  ;;  %v563_v13 = vpop.permute.xlu0 %562 }
 0x15f   : > { %v572_v24 = vsel %vm570_vm14, %v563_v13, %v565_v10 }
 0x160   : > { %580 = vst [vmem:[#allocation2 + $0x68] sm:$0xc0] %v572_v24  ;;  %842 = vrot.lane.b32.xlu1 %v2118_v8, %s1932_s7 }
 0x161   : > { %840 = vrot.lane.b32.xlu0 %v2141_v17, %s1932_s7 }
 0x162   : > { %v569_v25 = vpop.permute.xlu1 %568  ;;  %v567_v26 = vpop.permute.xlu0 %566 }
 0x163   : > { %v573_v27 = vsel %vm570_vm14, %v565_v10, %v567_v26  ;;  %v574_v29 = vsel %vm570_vm14, %v567_v26, %v569_v25 }
 0x164   : > { %581 = vst [vmem:[#allocation2 + $0x70] sm:$0xc0] %v573_v27  ;;  %582 = vst [vmem:[#allocation2 + $0x78] sm:$0xc0] %v574_v29  ;;  %767 = vrot.lane.b32.xlu1 %v2118_v8, %s1929_s4  ;;  %s1944_s4 = smov 14  }
 0x165   : > { %844 = vrot.lane.b32.xlu0 %v2174_v23, %s1932_s7 }
 0x166   : > { %v2441_v30 = vpop.permute.xlu1 %585 }
 0x167   : > { %v561_v31 = vpop.permute.xlu0 %560  ;;  %v1344_v32 = vld [vmem:[#allocation2 + $0x68] sm:$0xff] }
 0x168   : > { %v571_v33 = vsel %vm570_vm14, %v561_v31, %v563_v13  ;;  %813 = vrot.lane.b32.xlu1 %v2141_v17, %s1931_s6  ;;  %1414 = vmatprep.subr.bf16.mxu0 %v1344_v32  ;;  %vm869_vm14 = vcmask 326656   ;;  %s1946_s6 = smov 12  }
 0x169   : > { %579 = vst [vmem:[#allocation2 + $0x60] sm:$0xc0] %v571_v33  ;;  %790 = vrot.lane.b32.xlu0 %v2122_v11, %s1930_s5  ;;  %s1945_s5 = smov 13  }
 0x16a   : > { %v590_v34 = vpop.permute.xlu1 %589 }
 0x16b   : > { %v588_v35 = vpop.permute.xlu0 %587  ;;  %v1346_v36 = vld [vmem:[#allocation2 + $0x78] sm:$0xff]  ;;  %v1345_v37 = vld [vmem:[#allocation2 + $0x70] sm:$0xff] }
 0x16c   : > { %v595_v38 = vsel %vm593_vm15, %v2441_v30, %v588_v35  ;;  %v596_v39 = vsel %vm593_vm15, %v588_v35, %v590_v34  ;;  %861 = vrot.lane.b32.xlu1 %v2126_v12, %s1933_s18  ;;  %1467 = vmatprep.subr.bf16.mxu1 %v1346_v36 }
 0x16d   : > { %603 = vst [vmem:[#allocation2 + $0x88] sm:$0x3] %v595_v38  ;;  %604 = vst [vmem:[#allocation2 + $0x90] sm:$0x3] %v596_v39  ;;  %836 = vrot.lane.b32.xlu0 %v2166_v22, %s1932_s7  ;;  %1468 = vmatpush1.bf16.msra.mxu1 %v1345_v37  ;;  %s1949_s7 = smov 119  }
 0x16e   : > { %v2455_v40 = vpop.permute.xlu1 %608 }
 0x16f   : > { %v592_v41 = vpop.permute.xlu0 %591 }
 0x170   : > { %v597_v42 = vsel %vm593_vm15, %v590_v34, %v592_v41  ;;  %865 = vrot.lane.b32.xlu1 %v2133_v15, %s1933_s18  ;;  %v1343_v43 = vld [vmem:[#allocation2 + $0x60] sm:$0xff] }
 0x171   : > { %605 = vst [vmem:[#allocation2 + $0x98] sm:$0x3] %v597_v42  ;;  %863 = vrot.lane.b32.xlu0 %v2128_v14, %s1933_s18  ;;  %1415 = vmatpush1.bf16.msra.mxu0 %v1343_v43 }
 0x172   : > { %v613_v44 = vpop.permute.xlu1 %612 }
 0x173   : > { %v611_v45 = vpop.permute.xlu0 %610 }
 0x174   : > { %v618_v46 = vsel %vm616_vm0, %v2455_v40, %v611_v45  ;;  %v619_v47 = vsel %vm616_vm0, %v611_v45, %v613_v44  ;;  %884 = vrot.lane.b32.xlu1 %v2150_v19, %s1934_s24 }
 0x175   : > { %626 = vst [vmem:[#allocation2 + $0x88] sm:$0xc] %v618_v46  ;;  %627 = vst [vmem:[#allocation2 + $0x90] sm:$0xc] %v619_v47  ;;  %867 = vrot.lane.b32.xlu0 %v2144_v18, %s1933_s18 }
 0x176   : > { %v632_v48 = vpop.permute.xlu1 %631 }
 0x177   : > { %v615_v49 = vpop.permute.xlu0 %614 }
 0x178   : > { %v620_v51 = vsel %vm616_vm0, %v613_v44, %v615_v49  ;;  %888 = vrot.lane.b32.xlu1 %v2126_v12, %s1934_s24 }
 0x179   : > { %628 = vst [vmem:[#allocation2 + $0x98] sm:$0xc] %v620_v51  ;;  %886 = vrot.lane.b32.xlu0 %v2118_v8, %s1934_s24 }
 0x17a   : > { %v636_v52 = vpop.permute.xlu1 %635 }
 0x17b   : > { %v634_v54 = vpop.permute.xlu0 %633 }
 0x17c   : > { %v641_v55 = vsel %vm639_vm1, %v632_v48, %v634_v54  ;;  %v642_v56 = vsel %vm639_vm1, %v634_v54, %v636_v52  ;;  %907 = vrot.lane.b32.xlu1 %v2118_v8, %s1935_s25 }
 0x17d   : > { %649 = vst [vmem:[#allocation2 + $0x88] sm:$0x30] %v641_v55  ;;  %650 = vst [vmem:[#allocation2 + $0x90] sm:$0x30] %v642_v56  ;;  %890 = vrot.lane.b32.xlu0 %v2137_v16, %s1934_s24 }
 0x17e   : > { %v655_v57 = vpop.permute.xlu1 %654 }
 0x17f   : > { %v638_v59 = vpop.permute.xlu0 %637 }
 0x180   : > { %v643_v60 = vsel %vm639_vm1, %v636_v52, %v638_v59  ;;  %911 = vrot.lane.b32.xlu1 %v2128_v14, %s1935_s25 }
 0x181   : > { %651 = vst [vmem:[#allocation2 + $0x98] sm:$0x30] %v643_v60  ;;  %909 = vrot.lane.b32.xlu0 %v2154_v20, %s1935_s25 }
 0x182   : > { %v659_v61 = vpop.permute.xlu1 %658 }
 0x183   : > { %v657_v62 = vpop.permute.xlu0 %656 }
 0x184   : > { %v664_v63 = vsel %vm662_vm2, %v655_v57, %v657_v62  ;;  %v665_v0 = vsel %vm662_vm2, %v657_v62, %v659_v61  ;;  %930 = vrot.lane.b32.xlu1 %v2122_v11, %s1936_s23 }
 0x185   : > { %672 = vst [vmem:[#allocation2 + $0x88] sm:$0xc0] %v664_v63  ;;  %673 = vst [vmem:[#allocation2 + $0x90] sm:$0xc0] %v665_v0  ;;  %913 = vrot.lane.b32.xlu0 %v2160_v21, %s1935_s25 }
 0x186   : > { %v584_v2 = vpop.permute.xlu1 %583 }
 0x187   : > { %v594_v3 = vsel %vm593_vm15, %v584_v2, %v2441_v30  ;;  %v661_v5 = vpop.permute.xlu0 %660  ;;  %vm892_vm15 = vcmask 318464  }
 0x188   : > { %602 = vst [vmem:[#allocation2 + $0x80] sm:$0x3] %v594_v3  ;;  %v666_v6 = vsel %vm662_vm2, %v659_v61, %v661_v5  ;;  %934 = vrot.lane.b32.xlu1 %v2118_v8, %s1936_s23 }
 0x189   : > { %674 = vst [vmem:[#allocation2 + $0x98] sm:$0xc0] %v666_v6  ;;  %932 = vrot.lane.b32.xlu0 %v2141_v17, %s1936_s23 }
 0x18a   : > { %v630_v7 = vpop.permute.xlu1 %629 }
 0x18b   : > { %v640_v10 = vsel %vm639_vm1, %v630_v7, %v632_v48  ;;  %v607_v13 = vpop.permute.xlu0 %606 }
 0x18c   : > { %648 = vst [vmem:[#allocation2 + $0x80] sm:$0x30] %v640_v10  ;;  %v617_v24 = vsel %vm616_vm0, %v607_v13, %v2455_v40  ;;  %859 = vrot.lane.b32.xlu1 %v2118_v8, %s1933_s18  ;;  %v1348_v25 = vld [vmem:[#allocation2 + $0x88] sm:$0xff]  ;;  %v1349_v31 = vld [vmem:[#allocation2 + $0x90] sm:$0xff]  ;;  %vm915_vm0 = vcmask 310272   ;;  %s1636_s18 = sshll.u32 %s2110_s19, 7 }
 0x18d   : > { %625 = vst [vmem:[#allocation2 + $0x80] sm:$0xc] %v617_v24  ;;  %936 = vrot.lane.b32.xlu0 %v2174_v23, %s1936_s23  ;;  %1416 = vmatprep.subr.bf16.mxu0 %v1348_v25 }
 0x18e   : > { %v2505_v26 = vpop.permute.xlu1 %677 }
 0x18f   : > { %v653_v27 = vpop.permute.xlu0 %652 }
 0x190   : > { %v663_v29 = vsel %vm662_vm2, %v653_v27, %v655_v57  ;;  %905 = vrot.lane.b32.xlu1 %v2141_v17, %s1935_s25  ;;  %v1350_v30 = vld [vmem:[#allocation2 + $0x98] sm:$0xff]  ;;  %vm938_vm2 = vcmask 302080   ;;  %s1652_s25 = sshll.u32 %s1991_s13, 11  ;;  %s1531_s13 = scalar_lea.sflag [#allocation5], %s2110_s19 }
 0x191   : > { %671 = vst [vmem:[#allocation2 + $0x80] sm:$0xc0] %v663_v29  ;;  %882 = vrot.lane.b32.xlu0 %v2122_v11, %s1934_s24  ;;  %1469 = vmatprep.subr.bf16.mxu1 %v1350_v30  ;;  %s2818_s24 = scalar_lea.vmem [#allocation8], %s1636_s18 }
 0x192   : > { %1470 = vmatpush1.bf16.msra.mxu1 %v1349_v31  ;;  %v682_v32 = vpop.permute.xlu1 %681 }
 0x193   : > { %v680_v33 = vpop.permute.xlu0 %679 }
 0x194   : > { %v687_v34 = vsel %vm685_vm6, %v2505_v26, %v680_v33  ;;  %v688_v35 = vsel %vm685_vm6, %v680_v33, %v682_v32  ;;  %953 = vrot.lane.b32.xlu1 %v2126_v12, %s1937_s20 }
 0x195   : > { %695 = vst [vmem:[#allocation2 + $0xa8] sm:$0x3] %v687_v34  ;;  %696 = vst [vmem:[#allocation2 + $0xb0] sm:$0x3] %v688_v35  ;;  %928 = vrot.lane.b32.xlu0 %v2166_v22, %s1936_s23  ;;  %s1544_s23 = sshll.u32 %s2818_s24, 4  ;;  %s2840_s23 = int_to_ptr.vmem [resolvable:$true] %s1544_s23 }
 0x196   : > { %v2519_v36 = vpop.permute.xlu1 %700 }
 0x197   : > { %v684_v37 = vpop.permute.xlu0 %683 }
 0x198   : > { %v689_v38 = vsel %vm685_vm6, %v682_v32, %v684_v37  ;;  %957 = vrot.lane.b32.xlu1 %v2133_v15, %s1937_s20  ;;  %v1347_v39 = vld [vmem:[#allocation2 + $0x80] sm:$0xff] }
 0x199   : > { %697 = vst [vmem:[#allocation2 + $0xb8] sm:$0x3] %v689_v38  ;;  %955 = vrot.lane.b32.xlu0 %v2128_v14, %s1937_s20  ;;  %1417 = vmatpush1.bf16.msra.mxu0 %v1347_v39 }
 0x19a   : > { %v705_v40 = vpop.permute.xlu1 %704 }
 0x19b   : > { %v703_v41 = vpop.permute.xlu0 %702 }
 0x19c   : > { %v710_v42 = vsel %vm708_vm7, %v2519_v36, %v703_v41  ;;  %v711_v43 = vsel %vm708_vm7, %v703_v41, %v705_v40  ;;  %976 = vrot.lane.b32.xlu1 %v2150_v19, %s1938_s26 }
 0x19d   : > { %718 = vst [vmem:[#allocation2 + $0xa8] sm:$0xc] %v710_v42  ;;  %719 = vst [vmem:[#allocation2 + $0xb0] sm:$0xc] %v711_v43  ;;  %959 = vrot.lane.b32.xlu0 %v2144_v18, %s1937_s20 }
 0x19e   : > { %v724_v44 = vpop.permute.xlu1 %723 }
 0x19f   : > { %v707_v45 = vpop.permute.xlu0 %706 }
 0x1a0   : > { %v712_v46 = vsel %vm708_vm7, %v705_v40, %v707_v45  ;;  %980 = vrot.lane.b32.xlu1 %v2126_v12, %s1938_s26 }
 0x1a1   : > { %720 = vst [vmem:[#allocation2 + $0xb8] sm:$0xc] %v712_v46  ;;  %978 = vrot.lane.b32.xlu0 %v2118_v8, %s1938_s26 }
 0x1a2   : > { %v728_v47 = vpop.permute.xlu1 %727 }
 0x1a3   : > { %v726_v48 = vpop.permute.xlu0 %725 }
 0x1a4   : > { %v733_v49 = vsel %vm731_vm8, %v724_v44, %v726_v48  ;;  %v734_v51 = vsel %vm731_vm8, %v726_v48, %v728_v47  ;;  %999 = vrot.lane.b32.xlu1 %v2118_v8, %s1939_s17 }
 0x1a5   : > { %741 = vst [vmem:[#allocation2 + $0xa8] sm:$0x30] %v733_v49  ;;  %742 = vst [vmem:[#allocation2 + $0xb0] sm:$0x30] %v734_v51  ;;  %982 = vrot.lane.b32.xlu0 %v2137_v16, %s1938_s26 }
 0x1a6   : > { %v747_v52 = vpop.permute.xlu1 %746 }
 0x1a7   : > { %v730_v54 = vpop.permute.xlu0 %729 }
 0x1a8   : > { %v735_v55 = vsel %vm731_vm8, %v728_v47, %v730_v54  ;;  %1003 = vrot.lane.b32.xlu1 %v2128_v14, %s1939_s17 }
 0x1a9   : > { %743 = vst [vmem:[#allocation2 + $0xb8] sm:$0x30] %v735_v55  ;;  %1001 = vrot.lane.b32.xlu0 %v2154_v20, %s1939_s17 }
 0x1aa   : > { %v751_v56 = vpop.permute.xlu1 %750 }
 0x1ab   : > { %v749_v57 = vpop.permute.xlu0 %748 }
 0x1ac   : > { %v756_v59 = vsel %vm754_vm9, %v747_v52, %v749_v57  ;;  %v757_v60 = vsel %vm754_vm9, %v749_v57, %v751_v56  ;;  %1022 = vrot.lane.b32.xlu1 %v2122_v11, %s1940_s22 }
 0x1ad   : > { %764 = vst [vmem:[#allocation2 + $0xa8] sm:$0xc0] %v756_v59  ;;  %765 = vst [vmem:[#allocation2 + $0xb0] sm:$0xc0] %v757_v60  ;;  %1005 = vrot.lane.b32.xlu0 %v2160_v21, %s1939_s17 }
 0x1ae   : > { %v676_v61 = vpop.permute.xlu1 %675 }
 0x1af   : > { %v686_v62 = vsel %vm685_vm6, %v676_v61, %v2505_v26  ;;  %v753_v63 = vpop.permute.xlu0 %752  ;;  %vm961_vm6 = vcmask 293888  }
 0x1b0   : > { %694 = vst [vmem:[#allocation2 + $0xa0] sm:$0x3] %v686_v62  ;;  %v758_v0 = vsel %vm754_vm9, %v751_v56, %v753_v63  ;;  %1026 = vrot.lane.b32.xlu1 %v2118_v8, %s1940_s22 }
 0x1b1   : > { %766 = vst [vmem:[#allocation2 + $0xb8] sm:$0xc0] %v758_v0  ;;  %1024 = vrot.lane.b32.xlu0 %v2141_v17, %s1940_s22 }
 0x1b2   : > { %v722_v2 = vpop.permute.xlu1 %721 }
 0x1b3   : > { %v732_v3 = vsel %vm731_vm8, %v722_v2, %v724_v44  ;;  %v699_v5 = vpop.permute.xlu0 %698  ;;  %vm1007_vm8 = vcmask 277504  }
 0x1b4   : > { %740 = vst [vmem:[#allocation2 + $0xa0] sm:$0x30] %v732_v3  ;;  %v709_v6 = vsel %vm708_vm7, %v699_v5, %v2519_v36  ;;  %951 = vrot.lane.b32.xlu1 %v2118_v8, %s1937_s20  ;;  %v1352_v7 = vld [vmem:[#allocation2 + $0xa8] sm:$0xff]  ;;  %v1353_v26 = vld [vmem:[#allocation2 + $0xb0] sm:$0xff]  ;;  %vm984_vm7 = vcmask 285696  }
 0x1b5   : > { %717 = vst [vmem:[#allocation2 + $0xa0] sm:$0xc] %v709_v6  ;;  %1028 = vrot.lane.b32.xlu0 %v2174_v23, %s1940_s22  ;;  %1418 = vmatprep.subr.bf16.mxu0 %v1352_v7 }
 0x1b6   : > { %v2569_v10 = vpop.permute.xlu1 %769 }
 0x1b7   : > { %v745_v13 = vpop.permute.xlu0 %744 }
 0x1b8   : > { %v755_v24 = vsel %vm754_vm9, %v745_v13, %v747_v52  ;;  %997 = vrot.lane.b32.xlu1 %v2141_v17, %s1939_s17  ;;  %v1354_v25 = vld [vmem:[#allocation2 + $0xb8] sm:$0xff]  ;;  %vm1030_vm9 = vcmask 146432   ;;  %s2838_s17 = scalar_lea.hbm %s2889_s2, %s1652_s25 }
 0x1b9   : > { %763 = vst [vmem:[#allocation2 + $0xa0] sm:$0xc0] %v755_v24  ;;  %974 = vrot.lane.b32.xlu0 %v2122_v11, %s1938_s26  ;;  %1471 = vmatprep.subr.bf16.mxu1 %v1354_v25 }
 0x1ba   : > { %1472 = vmatpush1.bf16.msra.mxu1 %v1353_v26  ;;  %v774_v27 = vpop.permute.xlu1 %773 }
 0x1bb   : > { %v772_v29 = vpop.permute.xlu0 %771 }
 0x1bc   : > { %v779_v30 = vsel %vm777_vm10, %v2569_v10, %v772_v29  ;;  %v780_v31 = vsel %vm777_vm10, %v772_v29, %v774_v27  ;;  %1045 = vrot.lane.b32.xlu1 %v2126_v12, %s1941_s15 }
 0x1bd   : > { %787 = vst [vmem:[#allocation2 + $0xc8] sm:$0x3] %v779_v30  ;;  %788 = vst [vmem:[#allocation2 + $0xd0] sm:$0x3] %v780_v31  ;;  %1020 = vrot.lane.b32.xlu0 %v2166_v22, %s1940_s22  ;;  %s1829_s22 = scalar_lea.vmem %s2840_s23, 2048 }
 0x1be   : > { %v2583_v32 = vpop.permute.xlu1 %792  ;;  %p1830_p13 = scmp.ne.s32.totalorder %s2840_s23, %s1829_s22 }
 0x1bf   : > { %v776_v33 = vpop.permute.xlu0 %775 }
 0x1c0   : > { %v781_v34 = vsel %vm777_vm10, %v774_v27, %v776_v33  ;;  %1049 = vrot.lane.b32.xlu1 %v2133_v15, %s1941_s15  ;;  %v1351_v35 = vld [vmem:[#allocation2 + $0xa0] sm:$0xff]  ;;  %p1831_p6 = pnand %p1830_p13, %p2061_p12 }
 0x1c1   : > { %789 = vst [vmem:[#allocation2 + $0xd8] sm:$0x3] %v781_v34  ;;  %1047 = vrot.lane.b32.xlu0 %v2128_v14, %s1941_s15  ;;  %1419 = vmatpush1.bf16.msra.mxu0 %v1351_v35 }
 0x1c2   : > { %v797_v36 = vpop.permute.xlu1 %796  ;;  %p1832_p8 = pneg %p1831_p6 }
 0x1c3   : > { %v795_v37 = vpop.permute.xlu0 %794 }
 0x1c4   : > { %v802_v38 = vsel %vm800_vm11, %v2583_v32, %v795_v37  ;;  %v803_v39 = vsel %vm800_vm11, %v795_v37, %v797_v36  ;;  %1068 = vrot.lane.b32.xlu1 %v2150_v19, %s1942_s30 }
 0x1c5   : > { %810 = vst [vmem:[#allocation2 + $0xc8] sm:$0xc] %v802_v38  ;;  %811 = vst [vmem:[#allocation2 + $0xd0] sm:$0xc] %v803_v39  ;;  %1051 = vrot.lane.b32.xlu0 %v2144_v18, %s1941_s15 }
 0x1c6   : > { %v816_v40 = vpop.permute.xlu1 %815 }
 0x1c7   : > { %v799_v41 = vpop.permute.xlu0 %798 }
 0x1c8   : > { %v804_v42 = vsel %vm800_vm11, %v797_v36, %v799_v41  ;;  %1072 = vrot.lane.b32.xlu1 %v2126_v12, %s1942_s30 }
 0x1c9   : > { %812 = vst [vmem:[#allocation2 + $0xd8] sm:$0xc] %v804_v42  ;;  %1070 = vrot.lane.b32.xlu0 %v2118_v8, %s1942_s30 }
 0x1ca   : > { %v820_v43 = vpop.permute.xlu1 %819 }
 0x1cb   : > { %v818_v44 = vpop.permute.xlu0 %817 }
 0x1cc   : > { %v825_v45 = vsel %vm823_vm12, %v816_v40, %v818_v44  ;;  %v826_v46 = vsel %vm823_vm12, %v818_v44, %v820_v43  ;;  %1091 = vrot.lane.b32.xlu1 %v2118_v8, %s1943_s3 }
 0x1cd   : > { %833 = vst [vmem:[#allocation2 + $0xc8] sm:$0x30] %v825_v45  ;;  %834 = vst [vmem:[#allocation2 + $0xd0] sm:$0x30] %v826_v46  ;;  %1074 = vrot.lane.b32.xlu0 %v2137_v16, %s1942_s30 }
 0x1ce   : > { %v839_v47 = vpop.permute.xlu1 %838 }
 0x1cf   : > { %v822_v48 = vpop.permute.xlu0 %821 }
 0x1d0   : > { %v827_v49 = vsel %vm823_vm12, %v820_v43, %v822_v48  ;;  %1095 = vrot.lane.b32.xlu1 %v2128_v14, %s1943_s3 }
 0x1d1   : > { %835 = vst [vmem:[#allocation2 + $0xd8] sm:$0x30] %v827_v49  ;;  %1093 = vrot.lane.b32.xlu0 %v2154_v20, %s1943_s3 }
 0x1d2   : > { %v843_v51 = vpop.permute.xlu1 %842 }
 0x1d3   : > { %v841_v52 = vpop.permute.xlu0 %840 }
 0x1d4   : > { %v848_v54 = vsel %vm846_vm13, %v839_v47, %v841_v52  ;;  %v849_v55 = vsel %vm846_vm13, %v841_v52, %v843_v51  ;;  %1114 = vrot.lane.b32.xlu1 %v2122_v11, %s1944_s4 }
 0x1d5   : > { %856 = vst [vmem:[#allocation2 + $0xc8] sm:$0xc0] %v848_v54  ;;  %857 = vst [vmem:[#allocation2 + $0xd0] sm:$0xc0] %v849_v55  ;;  %1097 = vrot.lane.b32.xlu0 %v2160_v21, %s1943_s3  ;;  %v2687_v55 = vcombine.high %v2144_v18, %v2144_v18 }
 0x1d6   : > { %v768_v56 = vpop.permute.xlu1 %767 }
 0x1d7   : > { %v778_v57 = vsel %vm777_vm10, %v768_v56, %v2569_v10  ;;  %v845_v59 = vpop.permute.xlu0 %844  ;;  %vm1053_vm10 = vcmask 138240  }
 0x1d8   : > { %786 = vst [vmem:[#allocation2 + $0xc0] sm:$0x3] %v778_v57  ;;  %v850_v60 = vsel %vm846_vm13, %v843_v51, %v845_v59  ;;  %1118 = vrot.lane.b32.xlu1 %v2118_v8, %s1944_s4 }
 0x1d9   : > { %858 = vst [vmem:[#allocation2 + $0xd8] sm:$0xc0] %v850_v60  ;;  %1116 = vrot.lane.b32.xlu0 %v2141_v17, %s1944_s4 }
 0x1da   : > { %v814_v61 = vpop.permute.xlu1 %813 }
 0x1db   : > { %v824_v62 = vsel %vm823_vm12, %v814_v61, %v816_v40  ;;  %v791_v63 = vpop.permute.xlu0 %790  ;;  %vm1099_vm12 = vcmask 121856  }
 0x1dc   : > { %832 = vst [vmem:[#allocation2 + $0xc0] sm:$0x30] %v824_v62  ;;  %v801_v0 = vsel %vm800_vm11, %v791_v63, %v2583_v32  ;;  %1043 = vrot.lane.b32.xlu1 %v2118_v8, %s1941_s15  ;;  %v1356_v2 = vld [vmem:[#allocation2 + $0xc8] sm:$0xff]  ;;  %v1357_v10 = vld [vmem:[#allocation2 + $0xd0] sm:$0xff]  ;;  %vm1076_vm11 = vcmask 130048   ;;  %s1952_s15 = smov [#allocation8]  }
 0x1dd   : > { %809 = vst [vmem:[#allocation2 + $0xc0] sm:$0xc] %v801_v0  ;;  %1120 = vrot.lane.b32.xlu0 %v2174_v23, %s1944_s4  ;;  %1420 = vmatprep.subr.bf16.mxu0 %v1356_v2 }
 0x1de   : > { %v2633_v3 = vpop.permute.xlu1 %861 }
 0x1df   : > { %v837_v5 = vpop.permute.xlu0 %836 }
 0x1e0   : > { %v847_v6 = vsel %vm846_vm13, %v837_v5, %v839_v47  ;;  %1089 = vrot.lane.b32.xlu1 %v2141_v17, %s1943_s3  ;;  %v1358_v7 = vld [vmem:[#allocation2 + $0xd8] sm:$0xff]  ;;  %vm1122_vm13 = vcmask 113664  }
 0x1e1   : > { %855 = vst [vmem:[#allocation2 + $0xc0] sm:$0xc0] %v847_v6  ;;  %1066 = vrot.lane.b32.xlu0 %v2122_v11, %s1942_s30  ;;  %1473 = vmatprep.subr.bf16.mxu1 %v1358_v7  ;;  %s1833_s30 = sshll.u32 %s1952_s15, 4  ;;  %s1834_s30 = int_to_ptr.vmem [resolvable:$false] %s1833_s30 }
 0x1e2   : > { %1474 = vmatpush1.bf16.msra.mxu1 %v1357_v10  ;;  %v866_v13 = vpop.permute.xlu1 %865  ;;  %s1835_s3 = scalar_lea.vmem %s1834_s30, 4096  ;;  %p1836_p10 = scmp.lt.s32.totalorder %s2840_s23, %s1834_s30 }
 0x1e3   : > { %v864_v24 = vpop.permute.xlu0 %863  ;;  %p1837_p11 = scmp.lt.s32.totalorder %s1835_s3, %s1829_s22 }
 0x1e4   : > { %v871_v25 = vsel %vm869_vm14, %v2633_v3, %v864_v24  ;;  %v872_v26 = vsel %vm869_vm14, %v864_v24, %v866_v13  ;;  %1137 = vrot.lane.b32.xlu1 %v2126_v12, %s1945_s5 }
 0x1e5   : > { %879 = vst [vmem:[#allocation2 + $0xe8] sm:$0x3] %v871_v25  ;;  %880 = vst [vmem:[#allocation2 + $0xf0] sm:$0x3] %v872_v26  ;;  %1112 = vrot.lane.b32.xlu0 %v2166_v22, %s1944_s4  ;;  %p1838_p3 = por %p1837_p11, %p1836_p10 }
 0x1e6   : > { %v885_v27 = vpop.permute.xlu1 %884 }
 0x1e7   : > { %v868_v29 = vpop.permute.xlu0 %867  ;;  %p1839_p7 = pnand %p1838_p3, %p1832_p8 }
 0x1e8   : > { %v873_v30 = vsel %vm869_vm14, %v866_v13, %v868_v29  ;;  %1141 = vrot.lane.b32.xlu1 %v2133_v15, %s1945_s5  ;;  %v1355_v31 = vld [vmem:[#allocation2 + $0xc0] sm:$0xff] }
 0x1e9   : > { %881 = vst [vmem:[#allocation2 + $0xf8] sm:$0x3] %v873_v30  ;;  %1139 = vrot.lane.b32.xlu0 %v2128_v14, %s1945_s5  ;;  %1421 = vmatpush1.bf16.msra.mxu0 %v1355_v31 }
 0x1ea   : > { %v889_v32 = vpop.permute.xlu1 %888 }
 0x1eb   : > { %v887_v33 = vpop.permute.xlu0 %886 }
 0x1ec   : > { %v894_v34 = vsel %vm892_vm15, %v885_v27, %v887_v33  ;;  %v895_v22 = vsel %vm892_vm15, %v887_v33, %v889_v32  ;;  %1160 = vrot.lane.b32.xlu1 %v2150_v19, %s1946_s6 }
 0x1ed   : > { %902 = vst [vmem:[#allocation2 + $0xe8] sm:$0xc] %v894_v34  ;;  %903 = vst [vmem:[#allocation2 + $0xf0] sm:$0xc] %v895_v22  ;;  %1143 = vrot.lane.b32.xlu0 %v2144_v18, %s1945_s5 }
 0x1ee   : > { %v908_v35 = vpop.permute.xlu1 %907 }
 0x1ef   : > { %v891_v36 = vpop.permute.xlu0 %890 }
 0x1f0   : > { %v896_v37 = vsel %vm892_vm15, %v889_v32, %v891_v36  ;;  %1164 = vrot.lane.b32.xlu1 %v2126_v12, %s1946_s6 }
 0x1f1   : > { %904 = vst [vmem:[#allocation2 + $0xf8] sm:$0xc] %v896_v37  ;;  %1162 = vrot.lane.b32.xlu0 %v2118_v8, %s1946_s6 }
 0x1f2   : > { %v912_v38 = vpop.permute.xlu1 %911 }
 0x1f3   : > { %v910_v39 = vpop.permute.xlu0 %909 }
 0x1f4   : > { %v917_v40 = vsel %vm915_vm0, %v908_v35, %v910_v39  ;;  %v918_v41 = vsel %vm915_vm0, %v910_v39, %v912_v38  ;;  %1181 = vrot.lane.b32.xlu1 %v2154_v20, %s1909_s27 }
 0x1f5   : > { %925 = vst [vmem:[#allocation2 + $0xe8] sm:$0x30] %v917_v40  ;;  %926 = vst [vmem:[#allocation2 + $0xf0] sm:$0x30] %v918_v41  ;;  %1166 = vrot.lane.b32.xlu0 %v2137_v16, %s1946_s6 }
 0x1f6   : > { %v931_v42 = vpop.permute.xlu1 %930 }
 0x1f7   : > { %v914_v43 = vpop.permute.xlu0 %913 }
 0x1f8   : > { %v919_v44 = vsel %vm915_vm0, %v912_v38, %v914_v43  ;;  %1197 = vrot.lane.b32.xlu1 %v2141_v17, %s1910_s28 }
 0x1f9   : > { %927 = vst [vmem:[#allocation2 + $0xf8] sm:$0x30] %v919_v44  ;;  %1183 = vrot.lane.b32.xlu0 %v2160_v21, %s1909_s27  ;;  %s1947_s27 = smov 121  }
 0x1fa   : > { %v935_v45 = vpop.permute.xlu1 %934 }
 0x1fb   : > { %v933_v46 = vpop.permute.xlu0 %932 }
 0x1fc   : > { %v940_v47 = vsel %vm938_vm2, %v931_v42, %v933_v46  ;;  %v941_v48 = vsel %vm938_vm2, %v933_v46, %v935_v45  ;;  %1135 = vrot.lane.b32.xlu1 %v2118_v8, %s1945_s5 }
 0x1fd   : > { %948 = vst [vmem:[#allocation2 + $0xe8] sm:$0xc0] %v940_v47  ;;  %949 = vst [vmem:[#allocation2 + $0xf0] sm:$0xc0] %v941_v48  ;;  %1199 = vrot.lane.b32.xlu0 %v2174_v23, %s1910_s28  ;;  %s1948_s28 = smov 120  }
 0x1fe   : > { %v860_v49 = vpop.permute.xlu1 %859 }
 0x1ff   : > { %v870_v51 = vsel %vm869_vm14, %v860_v49, %v2633_v3  ;;  %v937_v52 = vpop.permute.xlu0 %936  ;;  %v1234_v3 = vcombine.high %v2137_v16, %v2137_v16  ;;  %vm1145_vm14 = vcmask 105472  }
 0x200   : > { %878 = vst [vmem:[#allocation2 + $0xe0] sm:$0x3] %v870_v51  ;;  %v942_v54 = vsel %vm938_vm2, %v935_v45, %v937_v52  ;;  %1216 = vrot.lane.b32.xlu1 %v2133_v15, %s1911_s29  ;;  %v1767_v45 = vld [vmem:[#allocation3 + $0x4] ss:$8 sps:$4 sm:$0xff]  }
 0x201   : > { %950 = vst [vmem:[#allocation2 + $0xf8] sm:$0xc0] %v942_v54  ;;  %1158 = vrot.lane.b32.xlu0 %v2122_v11, %s1946_s6  ;;  %1645 = vmatprep.mubr.msk.bf16.mxu1 %vm639_vm1, %v1767_v45 }
 0x202   : > { %v906_v56 = vpop.permute.xlu1 %905  ;;  %1643 = vmatprep.mubr.msk.bf16.mxu0 %vm639_vm1, %v1767_v45 }
 0x203   : > { %v916_v57 = vsel %vm915_vm0, %v906_v56, %v908_v35  ;;  %v883_v59 = vpop.permute.xlu0 %882  ;;  %vm1291_vm0 = vcmask 973824  }
 0x204   : > { %924 = vst [vmem:[#allocation2 + $0xe0] sm:$0x30] %v916_v57  ;;  %v893_v60 = vsel %vm892_vm15, %v883_v59, %v885_v27  ;;  %1220 = vrot.lane.b32.xlu1 %v2687_v55, %s1911_s29  ;;  %v1360_v61 = vld [vmem:[#allocation2 + $0xe8] sm:$0xff]  ;;  %v1361_v5 = vld [vmem:[#allocation2 + $0xf0] sm:$0xff]  ;;  %vm1168_vm15 = vcmask 97280  }
 0x205   : > { %901 = vst [vmem:[#allocation2 + $0xe0] sm:$0xc] %v893_v60  ;;  %1218 = vrot.lane.b32.xlu0 %v2144_v18, %s1911_s29  ;;  %1422 = vmatprep.subr.bf16.mxu0 %v1360_v61 }
 0x206   : > { %v2697_v62 = vpop.permute.xlu1 %953 }
 0x207   : > { %v929_v63 = vpop.permute.xlu0 %928 }
 0x208   : > { %v939_v0 = vsel %vm938_vm2, %v929_v63, %v931_v42  ;;  %1239 = vrot.lane.b32.xlu1 %v2126_v12, %s1947_s27  ;;  %v1362_v2 = vld [vmem:[#allocation2 + $0xf8] sm:$0xff]  ;;  %vm1314_vm2 = vcmask 965632  }
 0x209   : > { %947 = vst [vmem:[#allocation2 + $0xe0] sm:$0xc0] %v939_v0  ;;  %1237 = vrot.lane.b32.xlu0 %v2118_v8, %s1947_s27  ;;  %1475 = vmatprep.subr.bf16.mxu1 %v1362_v2 }
 0x20a   : > { %1476 = vmatpush1.bf16.msra.mxu1 %v1361_v5  ;;  %v958_v6 = vpop.permute.xlu1 %957 }
 0x20b   : > { %v956_v7 = vpop.permute.xlu0 %955 }
 0x20c   : > { %v963_v10 = vsel %vm961_vm6, %v2697_v62, %v956_v7  ;;  %v964_v13 = vsel %vm961_vm6, %v956_v7, %v958_v6  ;;  %1243 = vrot.lane.b32.xlu1 %v1234_v3, %s1947_s27 }
 0x20d   : > { %971 = vst [vmem:[#allocation2 + $0x108] sm:$0x3] %v963_v10  ;;  %972 = vst [vmem:[#allocation2 + $0x110] sm:$0x3] %v964_v13  ;;  %1241 = vrot.lane.b32.xlu0 %v2137_v16, %s1947_s27 }
 0x20e   : > { %v2712_v24 = vpop.permute.xlu1 %976 }
 0x20f   : > { %v960_v25 = vpop.permute.xlu0 %959 }
 0x210   : > { %v965_v26 = vsel %vm961_vm6, %v958_v6, %v960_v25  ;;  %1262 = vrot.lane.b32.xlu1 %v2128_v14, %s1948_s28  ;;  %v1359_v27 = vld [vmem:[#allocation2 + $0xe0] sm:$0xff] }
 0x211   : > { %973 = vst [vmem:[#allocation2 + $0x118] sm:$0x3] %v965_v26  ;;  %1260 = vrot.lane.b32.xlu0 %v2154_v20, %s1948_s28  ;;  %1423 = vmatpush1.bf16.msra.mxu0 %v1359_v27 }
 0x212   : > { %v981_v29 = vpop.permute.xlu1 %980 }
 0x213   : > { %v979_v30 = vpop.permute.xlu0 %978 }
 0x214   : > { %v986_v31 = vsel %vm984_vm7, %v2712_v24, %v979_v30  ;;  %v987_v32 = vsel %vm984_vm7, %v979_v30, %v981_v29  ;;  %1266 = vrot.lane.b32.xlu1 %v2144_v18, %s1948_s28 }
 0x215   : > { %994 = vst [vmem:[#allocation2 + $0x108] sm:$0xc] %v986_v31  ;;  %995 = vst [vmem:[#allocation2 + $0x110] sm:$0xc] %v987_v32  ;;  %1264 = vrot.lane.b32.xlu0 %v2160_v21, %s1948_s28  ;;  %v1950_v21 = vmov 0  }
 0x216   : > { %v1000_v33 = vpop.permute.xlu1 %999  ;;  %177 = vst [vmem:[#allocation2 + $0x188] sm:$0xfc] %v1950_v21  ;;  %176 = vst [vmem:[#allocation2 + $0x180] sm:$0xfc] %v1950_v21 }
 0x217   : > { %v983_v34 = vpop.permute.xlu0 %982  ;;  %178 = vst [vmem:[#allocation2 + $0x190] sm:$0xfc] %v1950_v21  ;;  %179 = vst [vmem:[#allocation2 + $0x198] sm:$0xfc] %v1950_v21 }
 0x218   : > { %v988_v20 = vsel %vm984_vm7, %v981_v29, %v983_v34  ;;  %1285 = vrot.lane.b32.xlu1 %v2118_v8, %s1949_s7 }
 0x219   : > { %996 = vst [vmem:[#allocation2 + $0x118] sm:$0xc] %v988_v20  ;;  %1283 = vrot.lane.b32.xlu0 %v2141_v17, %s1949_s7 }
 0x21a   : > { %v1004_v22 = vpop.permute.xlu1 %1003 }
 0x21b   : > { %v1002_v35 = vpop.permute.xlu0 %1001 }
 0x21c   : > { %v1009_v36 = vsel %vm1007_vm8, %v1000_v33, %v1002_v35  ;;  %v1010_v37 = vsel %vm1007_vm8, %v1002_v35, %v1004_v22  ;;  %1289 = vrot.lane.b32.xlu1 %v2137_v16, %s1949_s7 }
 0x21d   : > { %1017 = vst [vmem:[#allocation2 + $0x108] sm:$0x30] %v1009_v36  ;;  %1018 = vst [vmem:[#allocation2 + $0x110] sm:$0x30] %v1010_v37  ;;  %1287 = vrot.lane.b32.xlu0 %v2174_v23, %s1949_s7 }
 0x21e   : > { %v1023_v38 = vpop.permute.xlu1 %1022 }
 0x21f   : > { %v1006_v17 = vpop.permute.xlu0 %1005 }
 0x220   : > { %v1011_v39 = vsel %vm1007_vm8, %v1004_v22, %v1006_v17  ;;  %1235 = vrot.lane.b32.xlu1 %v2150_v19, %s1947_s27 }
 0x221   : > { %1019 = vst [vmem:[#allocation2 + $0x118] sm:$0x30] %v1011_v39  ;;  %1214 = vrot.lane.b32.xlu0 %v2126_v12, %s1911_s29  ;;  %s1951_s29 = smov 118  }
 0x222   : > { %v1027_v16 = vpop.permute.xlu1 %1026 }
 0x223   : > { %v1025_v40 = vpop.permute.xlu0 %1024 }
 0x224   : > { %v1032_v23 = vsel %vm1030_vm9, %v1023_v38, %v1025_v40  ;;  %v1033_v41 = vsel %vm1030_vm9, %v1025_v40, %v1027_v16  ;;  %1281 = vrot.lane.b32.xlu1 %v2122_v11, %s1949_s7 }
 0x225   : > { %1040 = vst [vmem:[#allocation2 + $0x108] sm:$0xc0] %v1032_v23  ;;  %1041 = vst [vmem:[#allocation2 + $0x110] sm:$0xc0] %v1033_v41  ;;  %1258 = vrot.lane.b32.xlu0 %v2118_v8, %s1948_s28 }
 0x226   : > { %v952_v42 = vpop.permute.xlu1 %951 }
 0x227   : > { %v962_v19 = vsel %vm961_vm6, %v952_v42, %v2697_v62  ;;  %v1029_v43 = vpop.permute.xlu0 %1028 }
 0x228   : > { %970 = vst [vmem:[#allocation2 + $0x100] sm:$0x3] %v962_v19  ;;  %v1034_v44 = vsel %vm1030_vm9, %v1027_v16, %v1029_v43  ;;  %1308 = vrot.lane.b32.xlu1 %v2133_v15, %s1951_s29 }
 0x229   : > { %1042 = vst [vmem:[#allocation2 + $0x118] sm:$0xc0] %v1034_v44  ;;  %1306 = vrot.lane.b32.xlu0 %v2128_v14, %s1951_s29 }
 0x22a   : > { %v998_v11 = vpop.permute.xlu1 %997 }
 0x22b   : > { %v1008_v46 = vsel %vm1007_vm8, %v998_v11, %v1000_v33  ;;  %v975_v47 = vpop.permute.xlu0 %974 }
 0x22c   : > { %1016 = vst [vmem:[#allocation2 + $0x100] sm:$0x30] %v1008_v46  ;;  %v985_v8 = vsel %vm984_vm7, %v975_v47, %v2712_v24  ;;  %1312 = vrot.lane.b32.xlu1 %v2687_v55, %s1951_s29  ;;  %v1364_v48 = vld [vmem:[#allocation2 + $0x108] sm:$0xff]  ;;  %v1365_v52 = vld [vmem:[#allocation2 + $0x110] sm:$0xff] }
 0x22d   : > { %993 = vst [vmem:[#allocation2 + $0x100] sm:$0xc] %v985_v8  ;;  %1310 = vrot.lane.b32.xlu0 %v2144_v18, %s1951_s29  ;;  %1424 = vmatprep.subr.bf16.mxu0 %v1364_v48 }
 0x22e   : > { %v1046_v15 = vpop.permute.xlu1 %1045 }
 0x22f   : > { %v1021_v14 = vpop.permute.xlu0 %1020 }
 0x230   : > { %v1031_v49 = vsel %vm1030_vm9, %v1021_v14, %v1023_v38  ;;  %v1366_v51 = vld [vmem:[#allocation2 + $0x118] sm:$0xff] }
 0x231   : > { %1039 = vst [vmem:[#allocation2 + $0x100] sm:$0xc0] %v1031_v49  ;;  %1304 = vrot.lane.b32.xlu0 %v2126_v12, %s1951_s29  ;;  %1477 = vmatprep.subr.bf16.mxu1 %v1366_v51 }
 0x232   : > { %1478 = vmatpush1.bf16.msra.mxu1 %v1365_v52  ;;  %v1050_v54 = vpop.permute.xlu1 %1049 }
 0x233   : > { %v1048_v55 = vpop.permute.xlu0 %1047 }
 0x234   : > { %v1055_v56 = vsel %vm1053_vm10, %v1046_v15, %v1048_v55  ;;  %v1056_v18 = vsel %vm1053_vm10, %v1048_v55, %v1050_v54 }
 0x235   : > { %1063 = vst [vmem:[#allocation2 + $0x128] sm:$0x3] %v1055_v56  ;;  %1064 = vst [vmem:[#allocation2 + $0x130] sm:$0x3] %v1056_v18 }
 0x236   : > { %v1069_v57 = vpop.permute.xlu1 %1068 }
 0x237   : > { %v1052_v59 = vpop.permute.xlu0 %1051 }
 0x238   : > { %v1057_v60 = vsel %vm1053_vm10, %v1050_v54, %v1052_v59  ;;  %v1363_v61 = vld [vmem:[#allocation2 + $0x100] sm:$0xff] }
 0x239   : > { %1065 = vst [vmem:[#allocation2 + $0x138] sm:$0x3] %v1057_v60  ;;  %1425 = vmatpush1.bf16.msra.mxu0 %v1363_v61 }
 0x23a   : > { %v1073_v12 = vpop.permute.xlu1 %1072 }
 0x23b   : > { %v1071_v62 = vpop.permute.xlu0 %1070 }
 0x23c   : > { %v1078_v63 = vsel %vm1076_vm11, %v1069_v57, %v1071_v62  ;;  %v1079_v0 = vsel %vm1076_vm11, %v1071_v62, %v1073_v12 }
 0x23d   : > { %1086 = vst [vmem:[#allocation2 + $0x128] sm:$0xc] %v1078_v63  ;;  %1087 = vst [vmem:[#allocation2 + $0x130] sm:$0xc] %v1079_v0 }
 0x23e   : > { %v1092_v2 = vpop.permute.xlu1 %1091 }
 0x23f   : > { %v1075_v3 = vpop.permute.xlu0 %1074 }
 0x240   : > { %v1080_v5 = vsel %vm1076_vm11, %v1073_v12, %v1075_v3 }
 0x241   : > { %1088 = vst [vmem:[#allocation2 + $0x138] sm:$0xc] %v1080_v5 }
 0x242   : > { %v1096_v6 = vpop.permute.xlu1 %1095 }
 0x243   : > { %v1094_v7 = vpop.permute.xlu0 %1093 }
 0x244   : > { %v1101_v10 = vsel %vm1099_vm12, %v1092_v2, %v1094_v7  ;;  %v1102_v13 = vsel %vm1099_vm12, %v1094_v7, %v1096_v6 }
 0x245   : > { %1109 = vst [vmem:[#allocation2 + $0x128] sm:$0x30] %v1101_v10  ;;  %1110 = vst [vmem:[#allocation2 + $0x130] sm:$0x30] %v1102_v13 }
 0x246   : > { %v1115_v24 = vpop.permute.xlu1 %1114 }
 0x247   : > { %v1098_v25 = vpop.permute.xlu0 %1097 }
 0x248   : > { %v1103_v26 = vsel %vm1099_vm12, %v1096_v6, %v1098_v25 }
 0x249   : > { %1111 = vst [vmem:[#allocation2 + $0x138] sm:$0x30] %v1103_v26 }
 0x24a   : > { %v1119_v27 = vpop.permute.xlu1 %1118 }
 0x24b   : > { %v1117_v29 = vpop.permute.xlu0 %1116 }
 0x24c   : > { %v1124_v30 = vsel %vm1122_vm13, %v1115_v24, %v1117_v29  ;;  %v1125_v31 = vsel %vm1122_vm13, %v1117_v29, %v1119_v27 }
 0x24d   : > { %1132 = vst [vmem:[#allocation2 + $0x128] sm:$0xc0] %v1124_v30  ;;  %1133 = vst [vmem:[#allocation2 + $0x130] sm:$0xc0] %v1125_v31 }
 0x24e   : > { %v1044_v32 = vpop.permute.xlu1 %1043 }
 0x24f   : > { %v1054_v33 = vsel %vm1053_vm10, %v1044_v32, %v1046_v15  ;;  %v1121_v34 = vpop.permute.xlu0 %1120 }
 0x250   : > { %1062 = vst [vmem:[#allocation2 + $0x120] sm:$0x3] %v1054_v33  ;;  %v1126_v20 = vsel %vm1122_vm13, %v1119_v27, %v1121_v34 }
 0x251   : > { %1134 = vst [vmem:[#allocation2 + $0x138] sm:$0xc0] %v1126_v20 }
 0x252   : > { %v1090_v22 = vpop.permute.xlu1 %1089 }
 0x253   : > { %v1100_v35 = vsel %vm1099_vm12, %v1090_v22, %v1092_v2  ;;  %v1067_v36 = vpop.permute.xlu0 %1066 }
 0x254   : > { %1108 = vst [vmem:[#allocation2 + $0x120] sm:$0x30] %v1100_v35  ;;  %v1077_v37 = vsel %vm1076_vm11, %v1067_v36, %v1069_v57  ;;  %v1368_v21 = vld [vmem:[#allocation2 + $0x128] sm:$0xff]  ;;  %v1369_v40 = vld [vmem:[#allocation2 + $0x130] sm:$0xff] }
 0x255   : > { %1085 = vst [vmem:[#allocation2 + $0x120] sm:$0xc] %v1077_v37  ;;  %1426 = vmatprep.subr.bf16.mxu0 %v1368_v21 }
 0x256   : > { %v1138_v38 = vpop.permute.xlu1 %1137 }
 0x257   : > { %v1113_v17 = vpop.permute.xlu0 %1112 }
 0x258   : > { %v1123_v39 = vsel %vm1122_vm13, %v1113_v17, %v1115_v24  ;;  %v1370_v16 = vld [vmem:[#allocation2 + $0x138] sm:$0xff] }
 0x259   : > { %1131 = vst [vmem:[#allocation2 + $0x120] sm:$0xc0] %v1123_v39  ;;  %1479 = vmatprep.subr.bf16.mxu1 %v1370_v16 }
 0x25a   : > { %1480 = vmatpush1.bf16.msra.mxu1 %v1369_v40  ;;  %v1142_v23 = vpop.permute.xlu1 %1141 }
 0x25b   : > { %v1140_v41 = vpop.permute.xlu0 %1139 }
 0x25c   : > { %v1147_v42 = vsel %vm1145_vm14, %v1138_v38, %v1140_v41  ;;  %v1148_v19 = vsel %vm1145_vm14, %v1140_v41, %v1142_v23 }
 0x25d   : > { %1155 = vst [vmem:[#allocation2 + $0x148] sm:$0x3] %v1147_v42  ;;  %1156 = vst [vmem:[#allocation2 + $0x150] sm:$0x3] %v1148_v19 }
 0x25e   : > { %v1161_v43 = vpop.permute.xlu1 %1160 }
 0x25f   : > { %v1144_v44 = vpop.permute.xlu0 %1143 }
 0x260   : > { %v1149_v11 = vsel %vm1145_vm14, %v1142_v23, %v1144_v44  ;;  %v1367_v45 = vld [vmem:[#allocation2 + $0x120] sm:$0xff] }
 0x261   : > { %1157 = vst [vmem:[#allocation2 + $0x158] sm:$0x3] %v1149_v11  ;;  %1427 = vmatpush1.bf16.msra.mxu0 %v1367_v45 }
 0x262   : > { %v1165_v46 = vpop.permute.xlu1 %1164 }
 0x263   : > { %v1163_v47 = vpop.permute.xlu0 %1162 }
 0x264   : > { %v1170_v8 = vsel %vm1168_vm15, %v1161_v43, %v1163_v47  ;;  %v1171_v48 = vsel %vm1168_vm15, %v1163_v47, %v1165_v46 }
 0x265   : > { %1178 = vst [vmem:[#allocation2 + $0x148] sm:$0xc] %v1170_v8  ;;  %1179 = vst [vmem:[#allocation2 + $0x150] sm:$0xc] %v1171_v48 }
 0x266   : > { %v1182_v15 = vpop.permute.xlu1 %1181 }
 0x267   : > { %v1185_v14 = vsel %vm317_vm3, %v2260_v50, %v1182_v15  ;;  %v1186_v49 = vsel %vm317_vm3, %v1182_v15, %v2265_v53  ;;  %v1167_v51 = vpop.permute.xlu0 %1166 }
 0x268   : > { %1193 = vst [vmem:[#allocation2 + $0x140] sm:$0x30] %v1185_v14  ;;  %1194 = vst [vmem:[#allocation2 + $0x148] sm:$0x30] %v1186_v49  ;;  %v1172_v52 = vsel %vm1168_vm15, %v1165_v46, %v1167_v51 }
 0x269   : > { %1180 = vst [vmem:[#allocation2 + $0x158] sm:$0xc] %v1172_v52 }
 0x26a   : > { %v1198_v54 = vpop.permute.xlu1 %1197 }
 0x26b   : > { %v1201_v55 = vsel %vm340_vm4, %v2284_v1, %v1198_v54  ;;  %v1202_v56 = vsel %vm340_vm4, %v1198_v54, %v2292_v4  ;;  %v1184_v18 = vpop.permute.xlu0 %1183 }
 0x26c   : > { %1209 = vst [vmem:[#allocation2 + $0x140] sm:$0xc0] %v1201_v55  ;;  %1210 = vst [vmem:[#allocation2 + $0x148] sm:$0xc0] %v1202_v56  ;;  %v1187_v50 = vsel %vm317_vm3, %v2265_v53, %v1184_v18  ;;  %v1188_v57 = vsel %vm317_vm3, %v1184_v18, %v2274_v58  ;;  %vm1245_vm3 = vcmask 990208  }
 0x26d   : > { %1195 = vst [vmem:[#allocation2 + $0x150] sm:$0x30] %v1187_v50  ;;  %1196 = vst [vmem:[#allocation2 + $0x158] sm:$0x30] %v1188_v57  ;;  %v1765_v50 = vld [vmem:[#allocation3] ss:$8 sps:$4 sm:$0xff]  }
 0x26e   : > { %v1136_v59 = vpop.permute.xlu1 %1135  ;;  %v1768_v57 = vld [vmem:[#allocation3 + $0x14] ss:$8 sps:$4 sm:$0xff]  }
 0x26f   : > { %v1146_v60 = vsel %vm1145_vm14, %v1136_v59, %v1138_v38  ;;  %v1200_v61 = vpop.permute.xlu0 %1199 }
 0x270   : > { %1154 = vst [vmem:[#allocation2 + $0x140] sm:$0x3] %v1146_v60  ;;  %v1203_v1 = vsel %vm340_vm4, %v2292_v4, %v1200_v61  ;;  %v1204_v12 = vsel %vm340_vm4, %v1200_v61, %v2302_v9  ;;  %vm1268_vm4 = vcmask 982016   ;;  %v1770_v60 = vld [vmem:[#allocation3 + $0x10] ss:$8 sps:$4 sm:$0xff]  }
 0x271   : > { %1211 = vst [vmem:[#allocation2 + $0x150] sm:$0xc0] %v1203_v1  ;;  %1212 = vst [vmem:[#allocation2 + $0x158] sm:$0xc0] %v1204_v12 }
 0x272   : > { %v1217_v62 = vpop.permute.xlu1 %1216 }
 0x273   : > { %v1223_v53 = vsel %vm363_vm5, %v2316_v28, %v1217_v62  ;;  %v1159_v58 = vpop.permute.xlu0 %1158  ;;  %v1372_v63 = vld [vmem:[#allocation2 + $0x148] sm:$0xff] }
 0x274   : > { %1231 = vst [vmem:[#allocation2 + $0x168] sm:$0x3] %v1223_v53  ;;  %v1169_v0 = vsel %vm1168_vm15, %v1159_v58, %v1161_v43  ;;  %1428 = vmatprep.subr.bf16.mxu0 %v1372_v63 }
 0x275   : > { %1177 = vst [vmem:[#allocation2 + $0x140] sm:$0xc] %v1169_v0 }
 0x276   : > { %v1221_v2 = vpop.permute.xlu1 %1220 }
 0x277   : > { %v1219_v3 = vpop.permute.xlu0 %1218 }
 0x278   : > { %v1224_v4 = vsel %vm363_vm5, %v1217_v62, %v1219_v3  ;;  %v1225_v5 = vsel %vm363_vm5, %v1219_v3, %v1221_v2  ;;  %v1374_v9 = vld [vmem:[#allocation2 + $0x158] sm:$0xff]  ;;  %v1373_v6 = vld [vmem:[#allocation2 + $0x150] sm:$0xff] }
 0x279   : > { %1232 = vst [vmem:[#allocation2 + $0x170] sm:$0x3] %v1224_v4  ;;  %1233 = vst [vmem:[#allocation2 + $0x178] sm:$0x3] %v1225_v5  ;;  %1481 = vmatprep.subr.bf16.mxu1 %v1374_v9 }
 0x27a   : > { %1482 = vmatpush1.bf16.msra.mxu1 %v1373_v6  ;;  %v1240_v7 = vpop.permute.xlu1 %1239 }
 0x27b   : > { %v1238_v10 = vpop.permute.xlu0 %1237 }
 0x27c   : > { %v1247_v13 = vsel %vm1245_vm3, %v1238_v10, %v1240_v7  ;;  %v1371_v24 = vld [vmem:[#allocation2 + $0x140] sm:$0xff] }
 0x27d   : > { %1255 = vst [vmem:[#allocation2 + $0x168] sm:$0xc] %v1247_v13  ;;  %1429 = vmatpush1.bf16.msra.mxu0 %v1371_v24 }
 0x27e   : > { %v1244_v25 = vpop.permute.xlu1 %1243 }
 0x27f   : > { %v1242_v26 = vpop.permute.xlu0 %1241 }
 0x280   : > { %v1248_v27 = vsel %vm1245_vm3, %v1240_v7, %v1242_v26  ;;  %v1249_v29 = vsel %vm1245_vm3, %v1242_v26, %v1244_v25 }
 0x281   : > { %1256 = vst [vmem:[#allocation2 + $0x170] sm:$0xc] %v1248_v27  ;;  %1257 = vst [vmem:[#allocation2 + $0x178] sm:$0xc] %v1249_v29 }
 0x282   : > { %v1263_v30 = vpop.permute.xlu1 %1262 }
 0x283   : > { %v1261_v31 = vpop.permute.xlu0 %1260 }
 0x284   : > { %v1270_v32 = vsel %vm1268_vm4, %v1261_v31, %v1263_v30 }
 0x285   : > { %1278 = vst [vmem:[#allocation2 + $0x168] sm:$0x30] %v1270_v32 }
 0x286   : > { %v1267_v33 = vpop.permute.xlu1 %1266 }
 0x287   : > { %v1265_v34 = vpop.permute.xlu0 %1264 }
 0x288   : > { %v1271_v20 = vsel %vm1268_vm4, %v1263_v30, %v1265_v34  ;;  %v1272_v22 = vsel %vm1268_vm4, %v1265_v34, %v1267_v33 }
 0x289   : > { %1279 = vst [vmem:[#allocation2 + $0x170] sm:$0x30] %v1271_v20  ;;  %1280 = vst [vmem:[#allocation2 + $0x178] sm:$0x30] %v1272_v22 }
 0x28a   : > { %v1286_v35 = vpop.permute.xlu1 %1285 }
 0x28b   : > { %v1284_v36 = vpop.permute.xlu0 %1283 }
 0x28c   : > { %v1293_v37 = vsel %vm1291_vm0, %v1284_v36, %v1286_v35 }
 0x28d   : > { %1301 = vst [vmem:[#allocation2 + $0x168] sm:$0xc0] %v1293_v37 }
 0x28e   : > { %v1290_v21 = vpop.permute.xlu1 %1289 }
 0x28f   : > { %v1288_v38 = vpop.permute.xlu0 %1287 }
 0x290   : > { %v1294_v17 = vsel %vm1291_vm0, %v1286_v35, %v1288_v38  ;;  %v1295_v39 = vsel %vm1291_vm0, %v1288_v38, %v1290_v21 }
 0x291   : > { %1302 = vst [vmem:[#allocation2 + $0x170] sm:$0xc0] %v1294_v17  ;;  %1303 = vst [vmem:[#allocation2 + $0x178] sm:$0xc0] %v1295_v39 }
 0x292   : > { %v1236_v16 = vpop.permute.xlu1 %1235 }
 0x293   : > { %v1246_v40 = vsel %vm1245_vm3, %v1236_v16, %v1238_v10  ;;  %v1215_v23 = vpop.permute.xlu0 %1214 }
 0x294   : > { %1254 = vst [vmem:[#allocation2 + $0x160] sm:$0xc] %v1246_v40  ;;  %v1222_v41 = vsel %vm363_vm5, %v1215_v23, %v2316_v28  ;;  %v1376_v42 = vld [vmem:[#allocation2 + $0x168] sm:$0xff] }
 0x295   : > { %1230 = vst [vmem:[#allocation2 + $0x160] sm:$0x3] %v1222_v41  ;;  %1430 = vmatprep.subr.bf16.mxu0 %v1376_v42 }
 0x296   : > { %v1282_v19 = vpop.permute.xlu1 %1281 }
 0x297   : > { %v1292_v43 = vsel %vm1291_vm0, %v1282_v19, %v1284_v36  ;;  %v1259_v44 = vpop.permute.xlu0 %1258 }
 0x298   : > { %1300 = vst [vmem:[#allocation2 + $0x160] sm:$0xc0] %v1292_v43  ;;  %v1269_v11 = vsel %vm1268_vm4, %v1259_v44, %v1261_v31  ;;  %v1378_v45 = vld [vmem:[#allocation2 + $0x178] sm:$0xff]  ;;  %v1377_v46 = vld [vmem:[#allocation2 + $0x170] sm:$0xff] }
 0x299   : > { %1277 = vst [vmem:[#allocation2 + $0x160] sm:$0x30] %v1269_v11  ;;  %1483 = vmatprep.subr.bf16.mxu1 %v1378_v45 }
 0x29a   : > { %1484 = vmatpush1.bf16.msra.mxu1 %v1377_v46  ;;  %v1309_v47 = vpop.permute.xlu1 %1308 }
 0x29b   : > { %v1307_v8 = vpop.permute.xlu0 %1306 }
 0x29c   : > { %v1316_v48 = vsel %vm1314_vm2, %v1307_v8, %v1309_v47 }
 0x29d   : > { %1324 = vst [vmem:[#allocation2 + $0x188] sm:$0x3] %v1316_v48 }
 0x29e   : > { %v1313_v28 = vpop.permute.xlu1 %1312 }
 0x29f   : > { %v1311_v15 = vpop.permute.xlu0 %1310 }
 0x2a0   : > { %v1317_v14 = vsel %vm1314_vm2, %v1309_v47, %v1311_v15  ;;  %v1318_v49 = vsel %vm1314_vm2, %v1311_v15, %v1313_v28  ;;  %v1375_v51 = vld [vmem:[#allocation2 + $0x160] sm:$0xff] }
 0x2a1   : > { %1325 = vst [vmem:[#allocation2 + $0x190] sm:$0x3] %v1317_v14  ;;  %1326 = vst [vmem:[#allocation2 + $0x198] sm:$0x3] %v1318_v49  ;;  %1431 = vmatpush1.bf16.msra.mxu0 %v1375_v51 }
 0x2a3   : > { %v1305_v52 = vpop.permute.xlu0 %1304 }
 0x2a4   : > { %v1315_v54 = vsel %vm1314_vm2, %v1305_v52, %v1307_v8  ;;  %v1380_v55 = vld [vmem:[#allocation2 + $0x188] sm:$0xff] }
 0x2a5   : > { %1323 = vst [vmem:[#allocation2 + $0x180] sm:$0x3] %v1315_v54  ;;  %1432 = vmatprep.subr.bf16.mxu0 %v1380_v55 }
 0x2a8   : > { %v1382_v56 = vld [vmem:[#allocation2 + $0x198] sm:$0xff]  ;;  %v1381_v18 = vld [vmem:[#allocation2 + $0x190] sm:$0xff] }
 0x2a9   : > { %1485 = vmatprep.subr.bf16.mxu1 %v1382_v56 }
 0x2aa   : > { %1486 = vmatpush1.bf16.msra.mxu1 %v1381_v18 }
 0x2ac   : > { %v1379_v59 = vld [vmem:[#allocation2 + $0x180] sm:$0xff] }
 0x2ad   : > { %1433 = vmatpush1.bf16.msra.mxu0 %v1379_v59  ;;  %1494 = vmatmul.mubr.bf16.vlgmr.msra.gmra.mrb[0].mxu1 %v1765_v50 }
 0x2ae   : > { %1646 = vmatprep.mubr.msk.bf16.mxu1 %vm639_vm1, %v1768_v57 }
 0x2b0   : > { %1441 = vmatmul.mubr.bf16.vlgmr.msra.gmra.mrb[0].mxu0 %v1765_v50 }
 0x2b1   : > { %1644 = vmatprep.mubr.msk.bf16.mxu0 %vm639_vm1, %v1768_v57 }
 0x2b5   : > { %1504 = vmatmul.mubr.bf16.gmra.mrb[4].mxu1 %v1770_v60 }
 0x2b8   : > { %1451 = vmatmul.mubr.bf16.gmra.mrb[4].mxu0 %v1770_v60 }
 0x380   : > { %v1495_v61 = vpop.f32.mrb[0].mxu1 }
 0x381   : > { %1516 = vst [vmem:[%s2818_s24 + $0x10] sm:$0xff] %v1495_v61  ;;  %v1497_v1 = vpop.f32.mrb[1].mxu1 }
 0x382   : > { %1517 = vst [vmem:[%s2818_s24 + $0x18] sm:$0xff] %v1497_v1  ;;  %v1499_v12 = vpop.f32.mrb[2].mxu1 }
 0x383   : > { %1520 = vst [vmem:[%s2818_s24 + $0x30] sm:$0xff] %v1499_v12  ;;  %v1442_v62 = vpop.f32.mrb[0].mxu0  ;;  %v1501_v53 = vpop.f32.mrb[3].mxu1 }
 0x384   : > { %1514 = vst [vmem:[%s2818_s24] sm:$0xff] %v1442_v62  ;;  %1521 = vst [vmem:[%s2818_s24 + $0x38] sm:$0xff] %v1501_v53  ;;  %v1444_v58 = vpop.f32.mrb[1].mxu0 }
 0x385   : > { %1515 = vst [vmem:[%s2818_s24 + $0x8] sm:$0xff] %v1444_v58  ;;  %v1446_v63 = vpop.f32.mrb[2].mxu0 }
 0x386   : > { %1518 = vst [vmem:[%s2818_s24 + $0x20] sm:$0xff] %v1446_v63  ;;  %v1448_v0 = vpop.f32.mrb[3].mxu0 }
 0x387   : > { %1519 = vst [vmem:[%s2818_s24 + $0x28] sm:$0xff] %v1448_v0 }
 0x388   : > { %v1505_v2 = vpop.f32.mrb[4].mxu1 }
 0x389   : > { %1524 = vst [vmem:[%s2818_s24 + $0x50] sm:$0xff] %v1505_v2  ;;  %v1507_v3 = vpop.f32.mrb[5].mxu1 }
 0x38a   : > { %1525 = vst [vmem:[%s2818_s24 + $0x58] sm:$0xff] %v1507_v3  ;;  %v1509_v4 = vpop.f32.mrb[6].mxu1 }
 0x38b   : > { %1528 = vst [vmem:[%s2818_s24 + $0x70] sm:$0xff] %v1509_v4  ;;  %v1452_v5 = vpop.f32.mrb[4].mxu0  ;;  %v1511_v9 = vpop.f32.mrb[7].mxu1 }
 0x38c   : > { %1522 = vst [vmem:[%s2818_s24 + $0x40] sm:$0xff] %v1452_v5  ;;  %1529 = vst [vmem:[%s2818_s24 + $0x78] sm:$0xff] %v1511_v9  ;;  %v1454_v6 = vpop.f32.mrb[5].mxu0 }
 0x38d   : > { %1523 = vst [vmem:[%s2818_s24 + $0x48] sm:$0xff] %v1454_v6  ;;  %v1456_v7 = vpop.f32.mrb[6].mxu0 }
 0x38e   : > { %1526 = vst [vmem:[%s2818_s24 + $0x60] sm:$0xff] %v1456_v7  ;;  %v1458_v10 = vpop.f32.mrb[7].mxu0 }
 0x38f   : > { %1527 = vst [vmem:[%s2818_s24 + $0x68] sm:$0xff] %v1458_v10 }
 0x390   : > { %1842 = shalt.err (!%p1839_p7)
}
 0x391   : > { %s1843_s4 = scalar_lea.hbm %s2838_s17, 2048  ;;  %s1847_s27 = scalar_lea.hbm %s2889_s2, 4096 }
 0x392   : > { %p1844_p9 = scmp.ne.s32.totalorder %s2838_s17, %s1843_s4  ;;  %p1848_p0 = scmp.lt.u32.totalorder %s2838_s17, %s2889_s2 }
 0x393   : > { %p1849_p1 = scmp.lt.u32.totalorder %s1847_s27, %s1843_s4  ;;  %p1851_p13 = scmp.lt.u32.totalorder %s1843_s4, %s2838_s17 }
 0x394   : > { %p1845_p2 = pnand %p1844_p9, %p2061_p12 }
 0x395   : > { %p1850_p4 = por %p1849_p1, %p1848_p0 }
 0x396   : > { %p1846_p5 = pneg %p1845_p2 }
 0x397   : > { %p1852_p6 = por %p1851_p13, %p1850_p4 }
 0x399   : > { %p1853_p8 = pnand %p1852_p6, %p1846_p5 }
 0x39b   : > { %1856 = shalt.err (!%p1853_p8)
}
 0x39c   : > { %s1953_s29 = smov 512   ;;  %s1954_s18 = smov 32  }
 0x39d   : > { %1662 = dma.vmem_to_hbm [thread:$0]  (%p2061_p12), %s2840_s23, 2048, %s2838_s17, %s1531_s13, %s1953_s29, %s1953_s29, %s1954_s18  }
 0x39e PF: > { %s1559_s24 = sand.u32 1, %s1887_s9   ;;  %p2904_p10 = scmp.ne.s32.totalorder %s2894_s16, 0 }
 0x39f   : > { %p2905_p11 = scmp.ge.s32.totalorder %s1899_s12, 2  ;;  %s1560_s25 = scalar_lea.sflag [#allocation5], %s1559_s24 }
 0x3a1   : > { %p1673_p3 = pnand %p2905_p11, %p2904_p10 }
 0x3a3   : > { %1882 = dma.done.wait (!%p1673_p3), %s1560_s25, 2048  }
 0x3a4   : > { %1884 = vsyncadd (!%p1673_p3), %s1560_s25, 4294965248  ;;  %p16_p7 = scmp.ge.s32.totalorder %s2026_s21, 4   ;;  %s2906_s9 = smov %s1891_s10 }
 0x3a5   : > { %s2907_s10 = smov %s1895_s11  ;;  %s2908_s11 = smov %s2057_s8 }
 0x3a6   : > { %s2909_s12 = smov %s2026_s21  ;;  %18 = sbr.rel (!%p16_p7) target bundleno = 6 (0x6), region = 78 }
 0x3ad   :  { %1565 = vsyncpa [#allocation4], 1 }
 0x3ae   :  { %1567 = vsyncpa [#allocation4 + $0x1], 1 }
 0x3af   :  { %1568 = vsyncpa [#allocation7], 1 }
 0x3b0   :  { %1570 = vsyncpa [#allocation7 + $0x1], 1 }
 0x3b1   :  { %1571 = vsyncpa [#allocation5], 1 }
 0x3b2   :  { %1573 = vsyncpa [#allocation5 + $0x1], 1 }

</bundles_post_ra>
